<compile_context>
chip_gen: v7x
topology: tpu7x:2x2x1
jax: 0.10.0
libtpu: 0.0.40
codegen_flags: <defaults>
</compile_context>

<pallas_src>
import jax
import jax.numpy as jnp
from jax.experimental import pallas as pl
from jax.experimental.pallas import tpu as pltpu

LANE = 128  # TPU lane width; all kernel-facing minor dims padded to this.


# ----------------------------------------------------------------------------
# Kernels
# ----------------------------------------------------------------------------
def _gcn_conv_kernel(adj_ref, x_ref, w_ref, b_ref, o_ref, acc_ref):
    """GCNConv + ReLU: accumulate Ahat@X over column tiles, finalize @W + b."""
    k = pl.program_id(1)

    @pl.when(k == 0)
    def _():
        acc_ref[...] = jnp.zeros_like(acc_ref)

    # bf16 x bf16 MXU matmul, f32 accumulation.
    acc_ref[...] += jnp.dot(adj_ref[...], x_ref[...],
                            preferred_element_type=jnp.float32)

    @pl.when(k == pl.num_programs(1) - 1)
    def _():
        h = jnp.dot(acc_ref[...].astype(jnp.bfloat16), w_ref[...],
                    preferred_element_type=jnp.float32) + b_ref[...]
        o_ref[...] = jnp.maximum(h, 0.0).astype(o_ref.dtype)


def _gcn_conv_linear_kernel(adj_ref, x_ref, w_ref, b_ref, wl_ref, bl_ref,
                            o_ref, acc_ref):
    """Last GCNConv + ReLU + fused Linear into a lane-dense (tm, 128) output."""
    k = pl.program_id(1)

    @pl.when(k == 0)
    def _():
        acc_ref[...] = jnp.zeros_like(acc_ref)

    acc_ref[...] += jnp.dot(adj_ref[...], x_ref[...],
                            preferred_element_type=jnp.float32)

    @pl.when(k == pl.num_programs(1) - 1)
    def _():
        h = jnp.dot(acc_ref[...].astype(jnp.bfloat16), w_ref[...],
                    preferred_element_type=jnp.float32) + b_ref[...]
        h = jnp.maximum(h, 0.0)
        y = jnp.dot(h.astype(jnp.bfloat16), wl_ref[...],
                    preferred_element_type=jnp.float32) + bl_ref[...]
        o_ref[...] = y.astype(o_ref.dtype)


# ----------------------------------------------------------------------------
# pallas_call wrappers
# ----------------------------------------------------------------------------
def _compiler_params():
    return pltpu.CompilerParams(
        dimension_semantics=("parallel", "arbitrary"),
        vmem_limit_bytes=64 * 1024 * 1024,
    )


def _gcn_conv(adj, x, w, b, *, tm, tk):
    n_pad = adj.shape[0]
    f_in = x.shape[1]
    h_out = w.shape[1]
    grid = (n_pad // tm, n_pad // tk)

    flops = 2 * n_pad * n_pad * f_in + 2 * n_pad * f_in * h_out
    bytes_accessed = (adj.size * 2 + x.size * 2 * grid[0]
                      + w.size * 2 + b.size * 4 + n_pad * h_out * 2)

    return pl.pallas_call(
        _gcn_conv_kernel,
        out_shape=jax.ShapeDtypeStruct((n_pad, h_out), jnp.bfloat16),
        grid_spec=pltpu.PrefetchScalarGridSpec(
            num_scalar_prefetch=0,
            grid=grid,
            in_specs=[
                pl.BlockSpec((tm, tk), lambda i, k: (i, k)),      # Ahat tile
                pl.BlockSpec((tk, f_in), lambda i, k: (k, 0)),    # X tile
                pl.BlockSpec((f_in, h_out), lambda i, k: (0, 0)),  # W (resident)
                pl.BlockSpec((1, h_out), lambda i, k: (0, 0)),     # bias
            ],
            out_specs=pl.BlockSpec((tm, h_out), lambda i, k: (i, 0)),
            scratch_shapes=[pltpu.VMEM((tm, f_in), jnp.float32)],
        ),
        compiler_params=_compiler_params(),
        cost_estimate=pl.CostEstimate(flops=flops, transcendentals=0,
                                      bytes_accessed=bytes_accessed),
    )(adj, x, w, b)


def _gcn_conv_linear(adj, x, w, b, wl, bl, *, tm, tk):
    n_pad = adj.shape[0]
    f_in = x.shape[1]
    h_mid = w.shape[1]
    grid = (n_pad // tm, n_pad // tk)

    flops = (2 * n_pad * n_pad * f_in + 2 * n_pad * f_in * h_mid
             + 2 * n_pad * h_mid * LANE)
    bytes_accessed = (adj.size * 2 + x.size * 2 * grid[0] + w.size * 2
                      + wl.size * 2 + n_pad * LANE * 4)

    return pl.pallas_call(
        _gcn_conv_linear_kernel,
        out_shape=jax.ShapeDtypeStruct((n_pad, LANE), jnp.float32),
        grid_spec=pltpu.PrefetchScalarGridSpec(
            num_scalar_prefetch=0,
            grid=grid,
            in_specs=[
                pl.BlockSpec((tm, tk), lambda i, k: (i, k)),       # Ahat tile
                pl.BlockSpec((tk, f_in), lambda i, k: (k, 0)),     # H1 tile
                pl.BlockSpec((f_in, h_mid), lambda i, k: (0, 0)),  # W2
                pl.BlockSpec((1, h_mid), lambda i, k: (0, 0)),     # b2
                pl.BlockSpec((h_mid, LANE), lambda i, k: (0, 0)),  # Wl (padded)
                pl.BlockSpec((1, LANE), lambda i, k: (0, 0)),      # bl (padded)
            ],
            out_specs=pl.BlockSpec((tm, LANE), lambda i, k: (i, 0)),
            scratch_shapes=[pltpu.VMEM((tm, f_in), jnp.float32)],
        ),
        compiler_params=_compiler_params(),
        cost_estimate=pl.CostEstimate(flops=flops, transcendentals=0,
                                      bytes_accessed=bytes_accessed),
    )(adj, x, w, b, wl, bl)


# ----------------------------------------------------------------------------
# Padding / tiling helpers + full forward
# ----------------------------------------------------------------------------
def _round_up(x, m):
    return (x + m - 1) // m * m


def _pad2(a, rows, cols):
    return jnp.zeros((rows, cols), a.dtype).at[:a.shape[0], :a.shape[1]].set(a)


def _pick_tile(n_pad, cap):
    """Largest multiple of 128 that divides n_pad and is <= cap (v7x-safe)."""
    m = n_pad // 128
    d = 1
    for cand in range(1, min(cap // 128, m) + 1):
        if m % cand == 0:
            d = cand
    return 128 * d


def _forward_impl(adj, x, w1, b1, w2, b2, wl, bl):
    num_nodes, f = x.shape
    h = w1.shape[1]

    n_pad = _round_up(max(num_nodes, 8), 128)
    f_pad = max(_round_up(f, 128), 128)
    h_pad = max(_round_up(h, 128), 128)
    tm = _pick_tile(n_pad, 256)   # row tile (activation/accumulator height)
    tk = _pick_tile(n_pad, 512)   # reduction tile over Ahat columns

    # Zero-pad to lane-friendly shapes; cast MXU operands to bf16.
    adj_p = _pad2(adj, n_pad, n_pad).astype(jnp.bfloat16)
    x_p = _pad2(x, n_pad, f_pad).astype(jnp.bfloat16)
    w1_p = _pad2(w1, f_pad, h_pad).astype(jnp.bfloat16)
    b1_p = _pad2(b1.reshape(1, -1), 1, h_pad)
    w2_p = _pad2(w2, h_pad, h_pad).astype(jnp.bfloat16)
    b2_p = _pad2(b2.reshape(1, -1), 1, h_pad)
    wl_p = _pad2(wl, h_pad, LANE).astype(jnp.bfloat16)
    bl_p = _pad2(bl.reshape(1, -1), 1, LANE)

    h1 = _gcn_conv(adj_p, x_p, w1_p, b1_p, tm=tm, tk=tk)
    y = _gcn_conv_linear(adj_p, h1, w2_p, b2_p, wl_p, bl_p, tm=tm, tk=tk)
    return y[:num_nodes, 0]   # .view(-1) of the (N, 1) Linear output


gcn_forward = jax.jit(_forward_impl)


# ----------------------------------------------------------------------------
# Host-side glue: graph densification, params, reference
# ----------------------------------------------------------------------------
def build_normalized_adjacency(edge_index, num_nodes):
    """Dense GCN-normalized adjacency: D^{-1/2} (A + I) D^{-1/2}."""
    # TODO(synk): .set() de-duplicates repeated edges; torch_geometric's
    # scatter-add counts duplicates in both message and degree.
    src, dst = edge_index[0], edge_index[1]
    a = jnp.zeros((num_nodes, num_nodes), jnp.float32)
    a = a.at[dst, src].set(1.0)                      # message flows src -> dst
    a = a + jnp.eye(num_nodes, dtype=jnp.float32)    # add self-loops
    deg = jnp.sum(a, axis=1)
    dinv = jnp.where(deg > 0, 1.0 / jnp.sqrt(deg), 0.0)
    return dinv[:, None] * a * dinv[None, :]


def init_params(key, num_features, num_hidden):
    k1, k2, k3, k4, k5, k6 = jax.random.split(key, 6)

    def glorot(k, fan_in, fan_out):
        s = jnp.sqrt(6.0 / (fan_in + fan_out))
        return jax.random.uniform(k, (fan_in, fan_out), jnp.float32, -s, s)

    w1 = glorot(k1, num_features, num_hidden)
    b1 = 0.1 * jax.random.normal(k4, (num_hidden,), jnp.float32)
    w2 = glorot(k2, num_hidden, num_hidden)
    b2 = 0.1 * jax.random.normal(k5, (num_hidden,), jnp.float32)
    wl = glorot(k3, num_hidden, 1)
    bl = 0.1 * jax.random.normal(k6, (1,), jnp.float32)
    return w1, b1, w2, b2, wl, bl


def reference_forward(adj, x, w1, b1, w2, b2, wl, bl, mxu_dtype=jnp.float32):
    """Plain-JAX reference; mxu_dtype=bf16 mirrors the kernel's MXU casts."""
    def mm(a, b):
        return jnp.dot(a.astype(mxu_dtype), b.astype(mxu_dtype),
                       preferred_element_type=jnp.float32)
    h = jnp.maximum(mm(mm(adj, x), w1) + b1, 0.0)
    h = jnp.maximum(mm(mm(adj, h), w2) + b2, 0.0)
    return (mm(h, wl) + bl).reshape(-1)


if __name__ == "__main__":
    num_nodes, num_features, num_hidden = 600, 8, 16
    num_edges = 3000

    key = jax.random.PRNGKey(0)
    kx, ke, kp = jax.random.split(key, 3)

    x = jax.random.normal(kx, (num_nodes, num_features), jnp.float32)
    edge_index = jax.random.randint(ke, (2, num_edges), 0, num_nodes,
                                    dtype=jnp.int32)

    adj = build_normalized_adjacency(edge_index, num_nodes)
    params = init_params(kp, num_features, num_hidden)

    out = gcn_forward(adj, x, *params)
    jax.block_until_ready(out)
    assert out.shape == (num_nodes,)

    # Tight check against a reference that mirrors the kernel's bf16 MXU casts.
    ref_bf16 = reference_forward(adj, x, *params, mxu_dtype=jnp.bfloat16)
    assert jnp.allclose(out, ref_bf16, atol=5e-3, rtol=5e-3), (
        f"max |err| vs bf16 ref: {jnp.max(jnp.abs(out - ref_bf16))}")

    # Looser sanity check against full-f32 math (bf16 rounding tolerance).
    ref_f32 = reference_forward(adj, x, *params, mxu_dtype=jnp.float32)
    assert jnp.allclose(out, ref_f32, atol=1e-1, rtol=1e-1), (
        f"max |err| vs f32 ref: {jnp.max(jnp.abs(out - ref_f32))}")

    print("KERNEL_OK")
</pallas_src>

<mosaic_0001>
module attributes {stable_mosaic.version = 11 : i64} {
  func.func @_gcn_conv_linear_kernel(%arg0: i32, %arg1: i32, %arg2: memref<128x128xbf16, #tpu.memory_space<vmem>>, %arg3: memref<128x128xbf16, #tpu.memory_space<vmem>>, %arg4: memref<128x128xbf16, #tpu.memory_space<vmem>>, %arg5: memref<1x128xf32, #tpu.memory_space<vmem>>, %arg6: memref<128x128xbf16, #tpu.memory_space<vmem>>, %arg7: memref<1x128xf32, #tpu.memory_space<vmem>>, %arg8: memref<128x128xf32, #tpu.memory_space<vmem>>, %arg9: memref<128x128xf32, #tpu.memory_space<vmem>>) attributes {dimension_semantics = [#tpu.dimension_semantics<parallel>, #tpu.dimension_semantics<arbitrary>], iteration_bounds = array<i64: 5, 5>, scalar_prefetch = 0 : i64, scratch_operands = 1 : i64, tpu.core_type = #tpu.core_type<tc>, window_params = [{transform_indices = @transform_0, window_bounds = array<i64: 128, 128>}, {transform_indices = @transform_1, window_bounds = array<i64: 128, 128>}, {pipeline_mode = #tpu.pipeline_mode<synchronous>, transform_indices = @transform_2, window_bounds = array<i64: 128, 128>}, {pipeline_mode = #tpu.pipeline_mode<synchronous>, transform_indices = @transform_3, window_bounds = array<i64: 1, 128>}, {pipeline_mode = #tpu.pipeline_mode<synchronous>, transform_indices = @transform_4, window_bounds = array<i64: 128, 128>}, {pipeline_mode = #tpu.pipeline_mode<synchronous>, transform_indices = @transform_5, window_bounds = array<i64: 1, 128>}, {transform_indices = @transform_6, window_bounds = array<i64: 128, 128>}]} {
    %c0_i32 = arith.constant 0 : i32
    %0 = arith.cmpi eq, %arg1, %c0_i32 : i32
    %1 = arith.extui %0 : i1 to i32
    %c0_i32_0 = arith.constant 0 : i32
    %2 = arith.cmpi ne, %1, %c0_i32_0 : i32
    scf.if %2 {
      %cst_9 = arith.constant 0.000000e+00 : f32
      %12 = vector.broadcast %cst_9 : f32 to vector<128x128xf32>
      %c0_10 = arith.constant 0 : index
      %c0_11 = arith.constant 0 : index
      %13 = vector.load %arg9[%c0_10, %c0_11] : memref<128x128xf32, #tpu.memory_space<vmem>>, vector<128x128xf32>
      tpu.vector_store %arg9[%c0_10, %c0_11], %12 {strides = array<i32>} : memref<128x128xf32, #tpu.memory_space<vmem>>, vector<128x128xf32>,
    } else {
    }
    %c0 = arith.constant 0 : index
    %c0_1 = arith.constant 0 : index
    %3 = vector.load %arg9[%c0, %c0_1] : memref<128x128xf32, #tpu.memory_space<vmem>>, vector<128x128xf32>
    %c0_2 = arith.constant 0 : index
    %c0_3 = arith.constant 0 : index
    %4 = vector.load %arg2[%c0_2, %c0_3] : memref<128x128xbf16, #tpu.memory_space<vmem>>, vector<128x128xbf16>
    %c0_4 = arith.constant 0 : index
    %c0_5 = arith.constant 0 : index
    %5 = vector.load %arg3[%c0_4, %c0_5] : memref<128x128xbf16, #tpu.memory_space<vmem>>, vector<128x128xbf16>
    %cst = arith.constant dense<0.000000e+00> : vector<128x128xf32>
    %6 = tpu.matmul %4, %5, %cst {dimension_numbers = #tpu.dot_dimension_numbers<[1], [0], [0], [1], [0, 0, 1, 1], [], []>} : vector<128x128xbf16>, vector<128x128xbf16>, vector<128x128xf32> -> vector<128x128xf32>
    %7 = arith.addf %3, %6 : vector<128x128xf32>
    %c0_6 = arith.constant 0 : index
    %c0_7 = arith.constant 0 : index
    %8 = vector.load %arg9[%c0_6, %c0_7] : memref<128x128xf32, #tpu.memory_space<vmem>>, vector<128x128xf32>
    tpu.vector_store %arg9[%c0_6, %c0_7], %7 {strides = array<i32>} : memref<128x128xf32, #tpu.memory_space<vmem>>, vector<128x128xf32>,
    %c4_i32 = arith.constant 4 : i32
    %9 = arith.cmpi eq, %arg1, %c4_i32 : i32
    %10 = arith.extui %9 : i1 to i32
    %c0_i32_8 = arith.constant 0 : i32
    %11 = arith.cmpi ne, %10, %c0_i32_8 : i32
    scf.if %11 {
      %c0_9 = arith.constant 0 : index
      %c0_10 = arith.constant 0 : index
      %12 = vector.load %arg9[%c0_9, %c0_10] : memref<128x128xf32, #tpu.memory_space<vmem>>, vector<128x128xf32>
      %13 = arith.truncf %12 : vector<128x128xf32> to vector<128x128xbf16>
      %c0_11 = arith.constant 0 : index
      %c0_12 = arith.constant 0 : index
      %14 = vector.load %arg4[%c0_11, %c0_12] : memref<128x128xbf16, #tpu.memory_space<vmem>>, vector<128x128xbf16>
      %cst_13 = arith.constant dense<0.000000e+00> : vector<128x128xf32>
      %15 = tpu.matmul %13, %14, %cst_13 {dimension_numbers = #tpu.dot_dimension_numbers<[1], [0], [0], [1], [0, 0, 1, 1], [], []>} : vector<128x128xbf16>, vector<128x128xbf16>, vector<128x128xf32> -> vector<128x128xf32>
      %c0_14 = arith.constant 0 : index
      %c0_15 = arith.constant 0 : index
      %16 = vector.load %arg5[%c0_14, %c0_15] : memref<1x128xf32, #tpu.memory_space<vmem>>, vector<1x128xf32>
      %17 = vector.broadcast %16 : vector<1x128xf32> to vector<128x128xf32>
      %18 = arith.addf %15, %17 : vector<128x128xf32>
      %cst_16 = arith.constant 0.000000e+00 : f32
      %19 = vector.broadcast %cst_16 : f32 to vector<128x128xf32>
      %20 = arith.maximumf %18, %19 : vector<128x128xf32>
      %21 = arith.truncf %20 : vector<128x128xf32> to vector<128x128xbf16>
      %c0_17 = arith.constant 0 : index
      %c0_18 = arith.constant 0 : index
      %22 = vector.load %arg6[%c0_17, %c0_18] : memref<128x128xbf16, #tpu.memory_space<vmem>>, vector<128x128xbf16>
      %cst_19 = arith.constant dense<0.000000e+00> : vector<128x128xf32>
      %23 = tpu.matmul %21, %22, %cst_19 {dimension_numbers = #tpu.dot_dimension_numbers<[1], [0], [0], [1], [0, 0, 1, 1], [], []>} : vector<128x128xbf16>, vector<128x128xbf16>, vector<128x128xf32> -> vector<128x128xf32>
      %c0_20 = arith.constant 0 : index
      %c0_21 = arith.constant 0 : index
      %24 = vector.load %arg7[%c0_20, %c0_21] : memref<1x128xf32, #tpu.memory_space<vmem>>, vector<1x128xf32>
      %25 = vector.broadcast %24 : vector<1x128xf32> to vector<128x128xf32>
      %26 = arith.addf %23, %25 : vector<128x128xf32>
      %c0_22 = arith.constant 0 : index
      %c0_23 = arith.constant 0 : index
      %27 = vector.load %arg8[%c0_22, %c0_23] : memref<128x128xf32, #tpu.memory_space<vmem>>, vector<128x128xf32>
      tpu.vector_store %arg8[%c0_22, %c0_23], %26 {strides = array<i32>} : memref<128x128xf32, #tpu.memory_space<vmem>>, vector<128x128xf32>,
    } else {
    }
    return
  }
  func.func @transform_0(%arg0: i32, %arg1: i32) -> (i32, i32) {
    %c0_i32 = arith.constant 0 : i32
    return %arg0, %arg1 : i32, i32
  }
  func.func @transform_1(%arg0: i32, %arg1: i32) -> (i32, i32) {
    %c0_i32 = arith.constant 0 : i32
    %c0_i32_0 = arith.constant 0 : i32
    return %arg1, %c0_i32 : i32, i32
  }
  func.func @transform_2(%arg0: i32, %arg1: i32) -> (i32, i32) {
    %c0_i32 = arith.constant 0 : i32
    %c0_i32_0 = arith.constant 0 : i32
    %c0_i32_1 = arith.constant 0 : i32
    return %c0_i32, %c0_i32_0 : i32, i32
  }
  func.func @transform_3(%arg0: i32, %arg1: i32) -> (i32, i32) {
    %c0_i32 = arith.constant 0 : i32
    %c0_i32_0 = arith.constant 0 : i32
    %c0_i32_1 = arith.constant 0 : i32
    return %c0_i32, %c0_i32_0 : i32, i32
  }
  func.func @transform_4(%arg0: i32, %arg1: i32) -> (i32, i32) {
    %c0_i32 = arith.constant 0 : i32
    %c0_i32_0 = arith.constant 0 : i32
    %c0_i32_1 = arith.constant 0 : i32
    return %c0_i32, %c0_i32_0 : i32, i32
  }
  func.func @transform_5(%arg0: i32, %arg1: i32) -> (i32, i32) {
    %c0_i32 = arith.constant 0 : i32
    %c0_i32_0 = arith.constant 0 : i32
    %c0_i32_1 = arith.constant 0 : i32
    return %c0_i32, %c0_i32_0 : i32, i32
  }
  func.func @transform_6(%arg0: i32, %arg1: i32) -> (i32, i32) {
    %c0_i32 = arith.constant 0 : i32
    %c0_i32_0 = arith.constant 0 : i32
    return %arg0, %c0_i32 : i32, i32
  }
}

module attributes {stable_mosaic.version = 11 : i64} {
  func.func @_gcn_conv_kernel(%arg0: i32, %arg1: i32, %arg2: memref<128x128xbf16, #tpu.memory_space<vmem>>, %arg3: memref<128x128xbf16, #tpu.memory_space<vmem>>, %arg4: memref<128x128xbf16, #tpu.memory_space<vmem>>, %arg5: memref<1x128xf32, #tpu.memory_space<vmem>>, %arg6: memref<128x128xbf16, #tpu.memory_space<vmem>>, %arg7: memref<128x128xf32, #tpu.memory_space<vmem>>) attributes {dimension_semantics = [#tpu.dimension_semantics<parallel>, #tpu.dimension_semantics<arbitrary>], iteration_bounds = array<i64: 5, 5>, scalar_prefetch = 0 : i64, scratch_operands = 1 : i64, tpu.core_type = #tpu.core_type<tc>, window_params = [{transform_indices = @transform_0, window_bounds = array<i64: 128, 128>}, {transform_indices = @transform_1, window_bounds = array<i64: 128, 128>}, {pipeline_mode = #tpu.pipeline_mode<synchronous>, transform_indices = @transform_2, window_bounds = array<i64: 128, 128>}, {pipeline_mode = #tpu.pipeline_mode<synchronous>, transform_indices = @transform_3, window_bounds = array<i64: 1, 128>}, {transform_indices = @transform_4, window_bounds = array<i64: 128, 128>}]} {
    %c0_i32 = arith.constant 0 : i32
    %0 = arith.cmpi eq, %arg1, %c0_i32 : i32
    %1 = arith.extui %0 : i1 to i32
    %c0_i32_0 = arith.constant 0 : i32
    %2 = arith.cmpi ne, %1, %c0_i32_0 : i32
    scf.if %2 {
      %cst_9 = arith.constant 0.000000e+00 : f32
      %12 = vector.broadcast %cst_9 : f32 to vector<128x128xf32>
      %c0_10 = arith.constant 0 : index
      %c0_11 = arith.constant 0 : index
      %13 = vector.load %arg7[%c0_10, %c0_11] : memref<128x128xf32, #tpu.memory_space<vmem>>, vector<128x128xf32>
      tpu.vector_store %arg7[%c0_10, %c0_11], %12 {strides = array<i32>} : memref<128x128xf32, #tpu.memory_space<vmem>>, vector<128x128xf32>,
    } else {
    }
    %c0 = arith.constant 0 : index
    %c0_1 = arith.constant 0 : index
    %3 = vector.load %arg7[%c0, %c0_1] : memref<128x128xf32, #tpu.memory_space<vmem>>, vector<128x128xf32>
    %c0_2 = arith.constant 0 : index
    %c0_3 = arith.constant 0 : index
    %4 = vector.load %arg2[%c0_2, %c0_3] : memref<128x128xbf16, #tpu.memory_space<vmem>>, vector<128x128xbf16>
    %c0_4 = arith.constant 0 : index
    %c0_5 = arith.constant 0 : index
    %5 = vector.load %arg3[%c0_4, %c0_5] : memref<128x128xbf16, #tpu.memory_space<vmem>>, vector<128x128xbf16>
    %cst = arith.constant dense<0.000000e+00> : vector<128x128xf32>
    %6 = tpu.matmul %4, %5, %cst {dimension_numbers = #tpu.dot_dimension_numbers<[1], [0], [0], [1], [0, 0, 1, 1], [], []>} : vector<128x128xbf16>, vector<128x128xbf16>, vector<128x128xf32> -> vector<128x128xf32>
    %7 = arith.addf %3, %6 : vector<128x128xf32>
    %c0_6 = arith.constant 0 : index
    %c0_7 = arith.constant 0 : index
    %8 = vector.load %arg7[%c0_6, %c0_7] : memref<128x128xf32, #tpu.memory_space<vmem>>, vector<128x128xf32>
    tpu.vector_store %arg7[%c0_6, %c0_7], %7 {strides = array<i32>} : memref<128x128xf32, #tpu.memory_space<vmem>>, vector<128x128xf32>,
    %c4_i32 = arith.constant 4 : i32
    %9 = arith.cmpi eq, %arg1, %c4_i32 : i32
    %10 = arith.extui %9 : i1 to i32
    %c0_i32_8 = arith.constant 0 : i32
    %11 = arith.cmpi ne, %10, %c0_i32_8 : i32
    scf.if %11 {
      %c0_9 = arith.constant 0 : index
      %c0_10 = arith.constant 0 : index
      %12 = vector.load %arg7[%c0_9, %c0_10] : memref<128x128xf32, #tpu.memory_space<vmem>>, vector<128x128xf32>
      %13 = arith.truncf %12 : vector<128x128xf32> to vector<128x128xbf16>
      %c0_11 = arith.constant 0 : index
      %c0_12 = arith.constant 0 : index
      %14 = vector.load %arg4[%c0_11, %c0_12] : memref<128x128xbf16, #tpu.memory_space<vmem>>, vector<128x128xbf16>
      %cst_13 = arith.constant dense<0.000000e+00> : vector<128x128xf32>
      %15 = tpu.matmul %13, %14, %cst_13 {dimension_numbers = #tpu.dot_dimension_numbers<[1], [0], [0], [1], [0, 0, 1, 1], [], []>} : vector<128x128xbf16>, vector<128x128xbf16>, vector<128x128xf32> -> vector<128x128xf32>
      %c0_14 = arith.constant 0 : index
      %c0_15 = arith.constant 0 : index
      %16 = vector.load %arg5[%c0_14, %c0_15] : memref<1x128xf32, #tpu.memory_space<vmem>>, vector<1x128xf32>
      %17 = vector.broadcast %16 : vector<1x128xf32> to vector<128x128xf32>
      %18 = arith.addf %15, %17 : vector<128x128xf32>
      %cst_16 = arith.constant 0.000000e+00 : f32
      %19 = vector.broadcast %cst_16 : f32 to vector<128x128xf32>
      %20 = arith.maximumf %18, %19 : vector<128x128xf32>
      %21 = arith.truncf %20 : vector<128x128xf32> to vector<128x128xbf16>
      %c0_17 = arith.constant 0 : index
      %c0_18 = arith.constant 0 : index
      %22 = vector.load %arg6[%c0_17, %c0_18] : memref<128x128xbf16, #tpu.memory_space<vmem>>, vector<128x128xbf16>
      tpu.vector_store %arg6[%c0_17, %c0_18], %21 {strides = array<i32>} : memref<128x128xbf16, #tpu.memory_space<vmem>>, vector<128x128xbf16>,
    } else {
    }
    return
  }
  func.func @transform_0(%arg0: i32, %arg1: i32) -> (i32, i32) {
    %c0_i32 = arith.constant 0 : i32
    return %arg0, %arg1 : i32, i32
  }
  func.func @transform_1(%arg0: i32, %arg1: i32) -> (i32, i32) {
    %c0_i32 = arith.constant 0 : i32
    %c0_i32_0 = arith.constant 0 : i32
    return %arg1, %c0_i32 : i32, i32
  }
  func.func @transform_2(%arg0: i32, %arg1: i32) -> (i32, i32) {
    %c0_i32 = arith.constant 0 : i32
    %c0_i32_0 = arith.constant 0 : i32
    %c0_i32_1 = arith.constant 0 : i32
    return %c0_i32, %c0_i32_0 : i32, i32
  }
  func.func @transform_3(%arg0: i32, %arg1: i32) -> (i32, i32) {
    %c0_i32 = arith.constant 0 : i32
    %c0_i32_0 = arith.constant 0 : i32
    %c0_i32_1 = arith.constant 0 : i32
    return %c0_i32, %c0_i32_0 : i32, i32
  }
  func.func @transform_4(%arg0: i32, %arg1: i32) -> (i32, i32) {
    %c0_i32 = arith.constant 0 : i32
    %c0_i32_0 = arith.constant 0 : i32
    return %arg0, %c0_i32 : i32, i32
  }
}

</mosaic_0001>

<bundles_post_ra>
// kernel: _forward_impl.2
= control target key start
LH: loop header
LB: loop body
LE: loop exit
PB: predicated region body
PF: predicated region fallthrough
CT: control target
= control target key end

     0   :  { %s2233_s0 = inlined_call_operand.hbm [shape: bf16[640,640], index: 0, kind: input, shape index: {}]   ;;  %s2234_s1 = inlined_call_operand.hbm [shape: bf16[640,128], index: 1, kind: input, shape index: {}]   ;;  %s2235_s2 = inlined_call_operand.hbm [shape: bf16[128,128], index: 2, kind: input, shape index: {}]   ;;  %s2236_s3 = inlined_call_operand.hbm [shape: f32[1,128], index: 3, kind: input, shape index: {}]   ;;  %s2237_s4 = inlined_call_operand.hbm [shape: bf16[640,128], index: 4, kind: output, shape index: {}]  }
   0x1   :  { %2261 = sst [smem:[#allocation26_spill]] %s2235_s2 }
   0x2   :  { %2262 = sst [smem:[#allocation27_spill]] %s2236_s3 }
   0x3   :  { %2263 = sst [smem:[#allocation28_spill]] %s2237_s4 }
   0x4   :  { %9 = vsyncpa [#allocation4], 0 }
   0x5   :  { %11 = vsyncpa [#allocation4 + $0x1], 0 }
   0x6   :  { %12 = vsyncpa [#allocation7], 0 }
   0x7   :  { %14 = vsyncpa [#allocation7 + $0x1], 0 }
   0x8   :  { %15 = vsyncpa [#allocation10], 0 }
   0x9   :  { %16 = vsyncpa [#allocation5], 0 }
   0xa   :  { %18 = vsyncpa [#allocation5 + $0x1], 0  ;;  %s1785_s15 = smov 0   ;;  %s1787_s16 = smov 0  }
   0xb   :  { %s1789_s17 = smov 0   ;;  %s1791_s18 = smov 0  }
   0xc   :  { %s1793_s19 = smov 0   ;;  %s1795_s20 = smov 0  }
   0xd   :  { %s1797_s21 = smov 0   ;;  %s1799_s22 = smov 0  }
   0xe   :  { %s1801_s23 = smov 0   ;;  %s1803_s24 = smov 0  }
   0xf   :  { %s1805_s25 = smov 0   ;;  %s1807_s26 = smov 0  }
  0x10   :  { %s1809_s27 = smov 0   ;;  %s1811_s28 = smov 0  }
  0x11 LB: > { %2264 = sst [smem:[#allocation17_spill]] %s1695_s15  ;;  %s1852_s29 = sadd.s32 4294967295, %s1747_s28   ;;  %s1747_s28 = sphi %s1811_s28, %s24_s28   ;;  %s1743_s27 = sphi %s1809_s27, %s2325_s27   ;;  %s1739_s26 = sphi %s1807_s26, %s2324_s26   ;;  %s1735_s25 = sphi %s1805_s25, %s2323_s25   ;;  %s1731_s24 = sphi %s1803_s24, %s2322_s24   ;;  %s1727_s23 = sphi %s1801_s23, %s2321_s23   ;;  %s1723_s22 = sphi %s1799_s22, %s2320_s22   ;;  %s1719_s21 = sphi %s1797_s21, %s2319_s21   ;;  %s1715_s20 = sphi %s1795_s20, %s2318_s20   ;;  %s1711_s19 = sphi %s1793_s19, %s2317_s19   ;;  %s1707_s18 = sphi %s1791_s18, %s2316_s18   ;;  %s1703_s17 = sphi %s1789_s17, %s2315_s17   ;;  %s1699_s16 = sphi %s1787_s16, %s2314_s16   ;;  %s1695_s15 = sphi %s1785_s15, %s2313_s15  }
  0x12   : > { %2265 = sst [smem:[#allocation18_spill]] %s1699_s16  ;;  %s1031_s30 = sadd.s32 4294967294, %s1747_s28  }
  0x13   : > { %2266 = sst [smem:[#allocation19_spill]] %s1731_s24  ;;  %p58_p0 = scmp.ne.s32.totalorder %s1723_s22, %s1719_s21 }
  0x14   : > { %2267 = sst [smem:[#allocation20_spill]] %s1735_s25  ;;  %p2241_p1 = scmp.eq.s32.totalorder %s1852_s29, 0 }
  0x15   : > { %2268 = sst [smem:[#allocation21_spill]] %s1852_s29  ;;  %p84_p2 = scmp.ne.s32.totalorder %s1711_s19, %s1707_s18 }
  0x16   : > { %p1861_p3 = por %p2241_p1, %p58_p0  ;;  %p149_p4 = scmp.ne.s32.totalorder %s1703_s17, %s1699_s16 }
  0x17   : > { %p1869_p5 = por %p84_p2, %p2241_p1  ;;  %p150_p6 = scmp.eq.s32.totalorder %s1852_s29, 24 }
  0x18   : > { %s2269_s6 = scalar_select %p1861_p3, 1, 0 }
  0x19   : > { %s2270_s7 = scalar_select %p1869_p5, 1, 0 }
  0x1a   : > { %p155_p7 = scmp.ne.s32.totalorder %s1699_s16, %s1695_s15  ;;  %p156_p8 = scmp.eq.s32.totalorder %s1031_s30, 24 }
  0x1b   : > { %2271 = sst [smem:[#allocation22_spill]] %s2270_s7  ;;  %p1876_p9 = por %p150_p6, %p149_p4 }
  0x1c   : > { %p1032_p10 = scmp.ge.s32.totalorder %s1747_s28, 1  ;;  %p1881_p11 = por %p156_p8, %p155_p7 }
  0x1d   : > { %s2272_s8 = scalar_select %p1876_p9, 1, 0 }
  0x1e   : > { %s2274_s9 = scalar_select %p1881_p11, 1, 0 }
  0x1f   : > { %2273 = sst [smem:[#allocation23_spill]] %s2272_s8  ;;  %p163_p12 = scmp.lt.s32.totalorder %s1747_s28, 26 }
  0x20   : > { %2275 = sst [smem:[#allocation24_spill]] %s2274_s9  ;;  %s1749_s11 = smov [#allocation8]  }
  0x21   : > { %p1886_p13 = pnand %p1032_p10, %p163_p12  ;;  %s175_s12 = sshll.u32 %s1749_s11, 4  ;;  %s176_s12 = int_to_ptr.vmem [resolvable:$true] %s175_s12 }
  0x22   : > { %s1750_s14 = smov [#allocation9]   ;;  %s2278_s2 = sld [smem:[#allocation26_spill]] }
  0x23   : > { %s2276_s10 = scalar_select %p1886_p13, 1, 0 }
  0x24   : > { %p1305_p0 = pneg %p1886_p13  ;;  %s189_s18 = sshll.u32 %s1750_s14, 4  ;;  %s1898_s18 = int_to_ptr.vmem [resolvable:$true] %s189_s18 }
  0x26   : > { %p1894_p2 = pnand %p1305_p0, %p2241_p1 }
  0x28   : > { %s1473_s5 = scalar_lea.hbm %s2278_s2, 1024  ;;  %p1475_p6 = pneg %p1894_p2 }
  0x29   : > { %p1474_p4 = scmp.ne.s32.totalorder %s2278_s2, %s1473_s5  ;;  %p1480_p10 = scmp.lt.u32.totalorder %s1473_s5, %s2278_s2 }
  0x2b   : > { %p1476_p7 = pnand %p1475_p6, %p1474_p4 }
  0x2d   : > { %p1477_p8 = pneg %p1476_p7 }
  0x2f   : > { %p1482_p12 = pnand %p1480_p10, %p1477_p8 }
  0x31   : > { %1485 = shalt.err (!%p1482_p12)
}
  0x32   : > { %s1486_s14 = scalar_lea.vmem %s176_s12, 1024  ;;  %p1494_p9 = scmp.lt.s32.totalorder %s176_s12, %s176_s12 }
  0x33   : > { %p1487_p0 = scmp.ne.s32.totalorder %s176_s12, %s1486_s14  ;;  %p1495_p5 = scmp.lt.s32.totalorder %s1486_s14, %s1486_s14 }
  0x35   : > { %p1489_p1 = pnand %p1487_p0, %p1475_p6  ;;  %p1496_p3 = por %p1495_p5, %p1494_p9 }
  0x37   : > { %p1490_p11 = pneg %p1489_p1 }
  0x39   : > { %p1497_p13 = pnand %p1496_p3, %p1490_p11 }
  0x3b   : > { %1500 = shalt.err (!%p1497_p13)
}
  0x3c   : > { %s2248_s9 = smov 64   ;;  %s2250_s21 = smov 4  }
  0x3d   : > { %1308 = dma.hbm_to_vmem [thread:$0]  (!%p1894_p2), %s2278_s2, 1024, %s176_s12, [#allocation7], %s2248_s9, %s2248_s9, %s2250_s21  }
  0x3e   : > { %s2279_s3 = sld [smem:[#allocation27_spill]] }
  0x44   : > { %s1501_s11 = scalar_lea.hbm %s2279_s3, 16 }
  0x45   : > { %p1502_p1 = scmp.ne.s32.totalorder %s2279_s3, %s1501_s11  ;;  %p1508_p9 = scmp.lt.u32.totalorder %s1501_s11, %s2279_s3 }
  0x47   : > { %p1504_p3 = pnand %p1502_p1, %p1475_p6 }
  0x49   : > { %p1505_p5 = pneg %p1504_p3 }
  0x4b   : > { %p1510_p11 = pnand %p1508_p9, %p1505_p5 }
  0x4d   : > { %1513 = shalt.err (!%p1510_p11)
}
  0x4e   : > { %s1514_s12 = scalar_lea.vmem %s1898_s18, 16  ;;  %s1521_s8 = scalar_lea.vmem %s1898_s18, 32 }
  0x4f   : > { %p1515_p13 = scmp.ne.s32.totalorder %s1898_s18, %s1514_s12  ;;  %p1522_p8 = scmp.lt.s32.totalorder %s1898_s18, %s1898_s18 }
  0x50   : > { %p1523_p10 = scmp.lt.s32.totalorder %s1521_s8, %s1514_s12 }
  0x51   : > { %p1517_p4 = pnand %p1515_p13, %p1475_p6 }
  0x52   : > { %p1524_p12 = por %p1523_p10, %p1522_p8 }
  0x53   : > { %p1518_p7 = pneg %p1517_p4 }
  0x55   : > { %p1525_p0 = pnand %p1524_p12, %p1518_p7 }
  0x57   : > { %1528 = shalt.err (!%p1525_p0)
}
  0x58   : > { %1311 = dma.hbm_to_vmem [thread:$0]  (!%p1894_p2), %s2279_s3, 16, %s1898_s18, [#allocation10]  }
  0x59   : > { %s33_s4 = sadd.s32 1, %s1739_s26  ;;  %s36_s15 = sadd.s32 1, %s1743_s27 }
  0x5a   : > { %p34_p6 = scmp.ge.s32.totalorder %s33_s4, 5  ;;  %s45_s13 = sadd.s32 1, %s1727_s23 }
  0x5b   : > { %p52_p1 = scmp.ne.s32.totalorder %s1727_s23, %s1723_s22  ;;  %p2260_p3 = scmp.eq.s32.totalorder %s1747_s28, 0 }
  0x5c   : > { %s2327_s4 = smov (%p34_p6, %s33_s4), 0  ;;  %s2329_s15 = smov (!%p34_p6, %s36_s15), %s1743_s27 }
  0x5d   : > { %2280 = sst [smem:[#allocation25_spill]] %s2327_s4  ;;  %s1962_s5 = ssub.s32 %s1739_s26, %s2327_s4 }
  0x5e   : > { %p1966_p2 = por %p2260_p3, %p52_p1  ;;  %p38_p5 = scmp.ge.s32.totalorder %s2329_s15, 5 }
  0x5f   : > { %p69_p9 = scmp.eq.s32.totalorder %s1962_s5, 0  ;;  %p2259_p11 = scmp.lt.s32.totalorder %s1747_s28, 25 }
  0x60   : > { %s200_s30 = sand.u32 1, %s1727_s23   ;;  %s2331_s15 = smov (%p38_p5, %s2329_s15), 0 }
  0x61   : > { %s1036_s11 = sshll.u32 %s200_s30, 6  ;;  %s40_s14 = ssub.s32 %s1743_s27, %s2331_s15 }
  0x62   : > { %s42_s12 = sor.u32 %s1962_s5, %s40_s14  ;;  %p137_p13 = scmp.eq.s32.totalorder %s40_s14, 0 }
  0x63   : > { %p43_p4 = scmp.eq.s32.totalorder %s42_s12, 0  ;;  %s1290_s8 = smul.u32 80, %s1743_s27 }
  0x64   : > { %s2282_s24 = sadd.s32 1, %s1703_s17  ;;  %s204_s2 = scalar_lea.vmem [#allocation3], %s1036_s11 }
  0x65   : > { %s1982_s25 = scalar_select %p137_p13, %s1703_s17, %s2282_s24  }
  0x66   : > { %s1985_s9 = scalar_select %p43_p4, %s1727_s23, %s45_s13  }
  0x67   : > { %s210_s21 = sadd.s32 %s1739_s26, %s1290_s8  ;;  %s213_s3 = sshll.u32 %s204_s2, 4  ;;  %s1988_s3 = int_to_ptr.vmem [resolvable:$true] %s213_s3 }
  0x68   : > { %s1039_s4 = sshll.u32 %s210_s21, 6  ;;  %p1999_p7 = pnand %p2259_p11, %p1966_p2 }
  0x69   : > { %s1993_s29 = scalar_lea.hbm %s2233_s0, %s1039_s4  ;;  %s2003_s2 = scalar_lea.sflag [#allocation4], %s200_s30 }
  0x6a   : > { %s1529_s21 = scalar_lea.hbm %s1993_s29, 1024  ;;  %p1531_p10 = pneg %p1999_p7 }
  0x6b   : > { %p1530_p8 = scmp.ne.s32.totalorder %s1993_s29, %s1529_s21  ;;  %s1534_s4 = scalar_lea.hbm %s2233_s0, 25600 }
  0x6c   : > { %p1535_p6 = scmp.lt.u32.totalorder %s1993_s29, %s2233_s0  ;;  %p1536_p1 = scmp.lt.u32.totalorder %s1534_s4, %s1529_s21 }
  0x6d   : > { %p1532_p12 = pnand %p1531_p10, %p1530_p8  ;;  %p1538_p5 = scmp.lt.u32.totalorder %s1529_s21, %s1993_s29 }
  0x6e   : > { %p1537_p2 = por %p1536_p1, %p1535_p6 }
  0x6f   : > { %p1533_p0 = pneg %p1532_p12 }
  0x70   : > { %p1539_p13 = por %p1538_p5, %p1537_p2 }
  0x72   : > { %p1540_p4 = pnand %p1539_p13, %p1533_p0 }
  0x74   : > { %1543 = shalt.err (!%p1540_p4)
}
  0x75   : > { %s1544_s30 = scalar_lea.vmem %s1988_s3, 1024  ;;  %s1753_s14 = smov [#allocation3]  }
  0x76   : > { %p1545_p8 = scmp.ne.s32.totalorder %s1988_s3, %s1544_s30  ;;  %s1549_s12 = sshll.u32 %s1753_s14, 4  ;;  %s1550_s12 = int_to_ptr.vmem [resolvable:$false] %s1549_s12 }
  0x77   : > { %s1551_s8 = scalar_lea.vmem %s1550_s12, 2048  ;;  %p1552_p3 = scmp.lt.s32.totalorder %s1988_s3, %s1550_s12 }
  0x78   : > { %p1547_p12 = pnand %p1545_p8, %p1531_p10  ;;  %p1553_p6 = scmp.lt.s32.totalorder %s1551_s8, %s1544_s30 }
  0x7a   : > { %p1548_p11 = pneg %p1547_p12  ;;  %p1554_p1 = por %p1553_p6, %p1552_p3 }
  0x7c   : > { %p1555_p2 = pnand %p1554_p1, %p1548_p11 }
  0x7e   : > { %1558 = shalt.err (!%p1555_p2)
}
  0x7f   : > { %s1754_s24 = smov 320   ;;  %s2284_s21 = smov 4  }
  0x80   : > { %s2285_s16 = smov 64   ;;  %s71_s7 = sadd.s32 1, %s1715_s20 }
  0x81   : > { %1315 = dma.hbm_to_vmem [thread:$0]  (!%p1999_p7), %s1993_s29, 1024, %s1988_s3, %s2003_s2, %s1754_s24, %s2285_s16, %s2284_s21  }
  0x82   : > { %p78_p3 = scmp.ne.s32.totalorder %s1715_s20, %s1711_s19  ;;  %p2286_p11 = scmp.eq.s32.totalorder %s1747_s28, 0 }
  0x83   : > { %s2039_s13 = scalar_select %p69_p9, %s1715_s20, %s71_s7  }
  0x84   : > { %p80_p10 = por %p78_p3, %p2286_p11  ;;  %s223_s4 = sand.u32 1, %s1747_s28  }
  0x85   : > { %s225_s18 = sand.u32 1, %s1715_s20   ;;  %s1097_s30 = sshll.u32 %s1739_s26, 10 }
  0x86   : > { %s1040_s11 = sshll.u32 %s225_s18, 6  ;;  %s2049_s8 = scalar_lea.hbm %s2234_s1, %s1097_s30 }
  0x87   : > { %s227_s3 = scalar_lea.vmem [#allocation6], %s1040_s11  ;;  %p2287_p7 = scmp.lt.s32.totalorder %s1747_s28, 25 }
  0x88   : > { %s234_s29 = sshll.u32 %s227_s3, 4  ;;  %s2059_s2 = scalar_lea.sflag [#allocation7], %s223_s4  ;;  %s2057_s29 = int_to_ptr.vmem [resolvable:$true] %s234_s29 }
  0x89   : > { %p2053_p9 = pnand %p2287_p7, %p80_p10  ;;  %s1559_s24 = scalar_lea.hbm %s2049_s8, 1024 }
  0x8a   : > { %p1560_p0 = scmp.ne.s32.totalorder %s2049_s8, %s1559_s24  ;;  %s1564_s11 = scalar_lea.hbm %s2234_s1, 5120 }
  0x8b   : > { %p1561_p5 = pneg %p2053_p9  ;;  %p1565_p8 = scmp.lt.u32.totalorder %s2049_s8, %s2234_s1 }
  0x8c   : > { %p1566_p12 = scmp.lt.u32.totalorder %s1564_s11, %s1559_s24  ;;  %p1568_p1 = scmp.lt.u32.totalorder %s1559_s24, %s2049_s8 }
  0x8d   : > { %p1562_p13 = pnand %p1561_p5, %p1560_p0 }
  0x8e   : > { %p1567_p6 = por %p1566_p12, %p1565_p8 }
  0x8f   : > { %p1563_p4 = pneg %p1562_p13 }
  0x90   : > { %p1569_p2 = por %p1568_p1, %p1567_p6 }
  0x92   : > { %p1570_p3 = pnand %p1569_p2, %p1563_p4 }
  0x94   : > { %1573 = shalt.err (!%p1570_p3)
}
  0x95   : > { %s1574_s4 = scalar_lea.vmem %s2057_s29, 1024  ;;  %s1755_s12 = smov [#allocation6]  }
  0x96   : > { %p1575_p11 = scmp.ne.s32.totalorder %s2057_s29, %s1574_s4  ;;  %s1579_s3 = sshll.u32 %s1755_s12, 4  ;;  %s1580_s3 = int_to_ptr.vmem [resolvable:$false] %s1579_s3 }
  0x97   : > { %s1581_s7 = scalar_lea.vmem %s1580_s3, 2048  ;;  %p1582_p0 = scmp.lt.s32.totalorder %s2057_s29, %s1580_s3 }
  0x98   : > { %p1577_p10 = pnand %p1575_p11, %p1561_p5  ;;  %p1583_p13 = scmp.lt.s32.totalorder %s1581_s7, %s1574_s4 }
  0x9a   : > { %p1578_p7 = pneg %p1577_p10  ;;  %p1584_p8 = por %p1583_p13, %p1582_p0 }
  0x9c   : > { %p1585_p12 = pnand %p1584_p8, %p1578_p7 }
  0x9e   : > { %1588 = shalt.err (!%p1585_p12)
}
  0x9f   : > { %1318 = dma.hbm_to_vmem [thread:$0]  (!%p2053_p9), %s2049_s8, 1024, %s2057_s29, %s2059_s2, %s2285_s16, %s2285_s16, %s2284_s21  }
  0xa0   : > { %p2289_p5 = scmp.ne.s32.totalorder %s2276_s10, 0 }
  0xa1   : > { %s248_s24 = sand.u32 (!%p2289_p5), 1, %s1723_s22   ;;  %p2290_p4 = scmp.ne.s32.totalorder (!%p2289_p5), %s2269_s6, 0 }
  0xa2   : > { %246 = sbr.rel (%p2289_p5) target bundleno = 722 (0x2d2), region = 36  ;;  %s1044_s18 = sshll.u32 (!%p2289_p5), %s248_s24, 6 }
  0xa3   : > { %s249_s11 = scalar_lea.sflag (!%p2289_p5), [#allocation4], %s248_s24  ;;  %s2093_s30 = scalar_lea.vmem (!%p2289_p5), [#allocation3], %s1044_s18 }
  0xa9   : > { %1674 = dma.done.wait (%p2290_p4), %s249_s11, 1024  }
  0xaa   : > { %1676 = vsyncadd (%p2290_p4), %s249_s11, 4294966272  ;;  %s2291_s5 = sld [smem:[#allocation21_spill]]  ;;  %s2292_s14 = sld [smem:[#allocation22_spill]] }
  0xab   : > { %s259_s21 = sand.u32 1, %s1711_s19  }
  0xac   : > { %s1045_s16 = sshll.u32 %s259_s21, 6 }
  0xad   : > { %s2101_s8 = scalar_lea.vmem [#allocation6], %s1045_s16 }
  0xb0   : > { %s257_s4 = sand.u32 1, %s2291_s5   ;;  %p2293_p9 = scmp.ne.s32.totalorder %s2292_s14, 0 }
  0xb1   : > { %s258_s10 = scalar_lea.sflag [#allocation7], %s257_s4 }
  0xb2   : > { %1678 = dma.done.wait (%p2293_p9), %s258_s10, 1024  }
  0xb3   : > { %1680 = vsyncadd (%p2293_p9), %s258_s10, 4294966272  ;;  %p2294_p6 = scmp.eq.s32.totalorder %s2291_s5, 0 }
  0xb5   : > { %1682 = dma.done.wait (%p2294_p6), [#allocation7], 1024   ;;  %p2295_p1 = pmov %p2294_p6 }
  0xb7   : > { %1684 = vsyncadd (%p2295_p1), [#allocation7], 4294966272  ;;  %p2296_p2 = pmov %p2295_p1 }
  0xb8   : > { %p2297_p3 = pmov %p2295_p1 }
  0xb9   : > { %1686 = dma.done.wait (%p2296_p2), [#allocation10], 16  }
  0xba   : > { %1688 = vsyncadd (%p2297_p3), [#allocation10], 4294967280  ;;  %s2298_s6 = sld [smem:[#allocation18_spill]]  ;;  %s2299_s3 = sld [smem:[#allocation19_spill]] }
  0xc0   : > { %s296_s29 = sand.u32 1, %s2298_s6   ;;  %p1049_p11 = scmp.ne.s32.totalorder %s2299_s3, 0 }
  0xc1   : > { %s1048_s2 = sshll.u32 %s296_s29, 6  ;;  %v1756_v0 = vmov (!%p1049_p11), 0.0  }
  0xc2   : > { %s2118_s12 = scalar_lea.vmem [#allocation11], %s1048_s2  ;;  %306 = sbr.rel (%p1049_p11) target bundleno = 202 (0xca), region = 56  ;;  %307 = vst [vmem:[#allocation2] sm:$0xff] (!%p1049_p11), %v1756_v0  ;;  %308 = vst [vmem:[#allocation2 + $0x8] sm:$0xff] (!%p1049_p11), %v1756_v0 }
  0xc3   : > { %309 = vst [vmem:[#allocation2 + $0x10] sm:$0xff] (!%p1049_p11), %v1756_v0  ;;  %310 = vst [vmem:[#allocation2 + $0x18] sm:$0xff] (!%p1049_p11), %v1756_v0 }
  0xc4   : > { %311 = vst [vmem:[#allocation2 + $0x20] sm:$0xff] (!%p1049_p11), %v1756_v0  ;;  %312 = vst [vmem:[#allocation2 + $0x28] sm:$0xff] (!%p1049_p11), %v1756_v0 }
  0xc5   : > { %313 = vst [vmem:[#allocation2 + $0x30] sm:$0xff] (!%p1049_p11), %v1756_v0  ;;  %314 = vst [vmem:[#allocation2 + $0x38] sm:$0xff] (!%p1049_p11), %v1756_v0 }
  0xc6   : > { %315 = vst [vmem:[#allocation2 + $0x40] sm:$0xff] (!%p1049_p11), %v1756_v0  ;;  %316 = vst [vmem:[#allocation2 + $0x48] sm:$0xff] (!%p1049_p11), %v1756_v0 }
  0xc7   : > { %317 = vst [vmem:[#allocation2 + $0x50] sm:$0xff] (!%p1049_p11), %v1756_v0  ;;  %318 = vst [vmem:[#allocation2 + $0x58] sm:$0xff] (!%p1049_p11), %v1756_v0 }
  0xc8   : > { %319 = vst [vmem:[#allocation2 + $0x60] sm:$0xff] (!%p1049_p11), %v1756_v0  ;;  %320 = vst [vmem:[#allocation2 + $0x68] sm:$0xff] (!%p1049_p11), %v1756_v0 }
  0xc9   : > { %321 = vst [vmem:[#allocation2 + $0x70] sm:$0xff] %v1756_v0  ;;  %322 = vst [vmem:[#allocation2 + $0x78] sm:$0xff] %v1756_v0 }
  0xca PF: > { %v1449_v1 = vld [vmem:[%s2101_s8] sm:$0xff]   ;;  %v1450_v2 = vld [vmem:[%s2101_s8 + $0x8] sm:$0xff]   ;;  %v1451_v3 = vld [vmem:[%s2101_s8 + $0x10] sm:$0xff]   ;;  %s2300_s7 = sld [smem:[#allocation19_spill]] }
  0xcb   : > { %1194 = vmatprep.subr.bf16.mxu0 %v1449_v1  ;;  %1258 = vmatprep.subr.bf16.mxu1 %v1449_v1  ;;  %v1452_v4 = vld [vmem:[%s2101_s8 + $0x18] sm:$0xff]   ;;  %v1457_v5 = vld [vmem:[%s2093_s30] sm:$0xff]   ;;  %v1454_v8 = vld [vmem:[%s2101_s8 + $0x28] sm:$0xff]  }
  0xcc   : > { %1195 = vmatpush3.bf16.msra.mxu0 %v1449_v1  ;;  %1266 = vmatpush3.bf16.msra.mxu1 %v1449_v1  ;;  %v1458_v6 = vld [vmem:[%s2093_s30 + $0x20] sm:$0xff]   ;;  %v1455_v9 = vld [vmem:[%s2101_s8 + $0x30] sm:$0xff]   ;;  %v1456_v10 = vld [vmem:[%s2101_s8 + $0x38] sm:$0xff]  }
  0xcd   : > { %1196 = vmatprep.subr.bf16.mxu0 %v1450_v2  ;;  %1259 = vmatprep.subr.bf16.mxu1 %v1450_v2  ;;  %v1453_v7 = vld [vmem:[%s2101_s8 + $0x20] sm:$0xff]   ;;  %v1459_v11 = vld [vmem:[%s2093_s30 + $0x8] sm:$0xff]   ;;  %v1461_v13 = vld [vmem:[%s2093_s30 + $0x10] sm:$0xff]  }
  0xce   : > { %1210 = vmatprep.mubr.bf16.mxu0 %v1457_v5  ;;  %1218 = vmatprep.mubr.bf16.mxu1 %v1458_v6  ;;  %v1460_v12 = vld [vmem:[%s2093_s30 + $0x28] sm:$0xff]   ;;  %v1462_v14 = vld [vmem:[%s2093_s30 + $0x30] sm:$0xff]   ;;  %v1463_v15 = vld [vmem:[%s2093_s30 + $0x18] sm:$0xff]  }
  0xcf   : > { %v1464_v16 = vld [vmem:[%s2093_s30 + $0x38] sm:$0xff]   ;;  %v325_v17 = vld [vmem:[#allocation2 + $0x10] sm:$0xff]  ;;  %v323_v19 = vld [vmem:[#allocation2] sm:$0xff] }
  0xd0   : > { %1197 = vmatpush3.bf16.msra.mxu0 %v1450_v2  ;;  %1267 = vmatpush3.bf16.msra.mxu1 %v1450_v2  ;;  %v333_v18 = vld [vmem:[#allocation2 + $0x50] sm:$0xff]  ;;  %v331_v20 = vld [vmem:[#allocation2 + $0x40] sm:$0xff]  ;;  %v326_v23 = vld [vmem:[#allocation2 + $0x18] sm:$0xff]  ;;  %p1066_p10 = scmp.ne.s32.totalorder %s2300_s7, 4 }
  0xd1   : > { %1198 = vmatprep.subr.bf16.mxu0 %v1451_v3  ;;  %1260 = vmatprep.subr.bf16.mxu1 %v1451_v3  ;;  %v334_v24 = vld [vmem:[#allocation2 + $0x58] sm:$0xff]  ;;  %v324_v29 = vld [vmem:[#allocation2 + $0x8] sm:$0xff]  ;;  %v329_v41 = vld [vmem:[#allocation2 + $0x30] sm:$0xff] }
  0xd2   : > { %v332_v30 = vld [vmem:[#allocation2 + $0x48] sm:$0xff]  ;;  %v337_v42 = vld [vmem:[#allocation2 + $0x70] sm:$0xff]  ;;  %v327_v43 = vld [vmem:[#allocation2 + $0x20] sm:$0xff] }
  0xd3   : > { %v335_v44 = vld [vmem:[#allocation2 + $0x60] sm:$0xff]  ;;  %v330_v47 = vld [vmem:[#allocation2 + $0x38] sm:$0xff]  ;;  %v328_v53 = vld [vmem:[#allocation2 + $0x28] sm:$0xff] }
  0xd4   : > { %1199 = vmatpush3.bf16.msra.mxu0 %v1451_v3  ;;  %1268 = vmatpush3.bf16.msra.mxu1 %v1451_v3  ;;  %v338_v48 = vld [vmem:[#allocation2 + $0x78] sm:$0xff]  ;;  %v336_v54 = vld [vmem:[#allocation2 + $0x68] sm:$0xff]  ;;  %v1465_v1 = vld [vmem:[#allocation8] sm:$0xff] (!%p1066_p10)  }
  0xd5   : > { %1200 = vmatprep.subr.bf16.mxu0 %v1452_v4  ;;  %1261 = vmatprep.subr.bf16.mxu1 %v1452_v4  ;;  %v1466_v2 = vld [vmem:[#allocation8 + $0x8] sm:$0xff] (!%p1066_p10)   ;;  %v1467_v3 = vld [vmem:[#allocation8 + $0x10] sm:$0xff] (!%p1066_p10)  }
  0xd8   : > { %1201 = vmatpush3.bf16.msra.mxu0 %v1452_v4  ;;  %1269 = vmatpush3.bf16.msra.mxu1 %v1452_v4  ;;  %v1468_v4 = vld [vmem:[#allocation8 + $0x18] sm:$0xff] (!%p1066_p10)  }
  0xd9   : > { %1202 = vmatprep.subr.bf16.mxu0 %v1453_v7  ;;  %1262 = vmatprep.subr.bf16.mxu1 %v1453_v7 }
  0xdc   : > { %1203 = vmatpush3.bf16.msra.mxu0 %v1453_v7  ;;  %1270 = vmatpush3.bf16.msra.mxu1 %v1453_v7 }
  0xdd   : > { %1204 = vmatprep.subr.bf16.mxu0 %v1454_v8  ;;  %1263 = vmatprep.subr.bf16.mxu1 %v1454_v8 }
  0xe0   : > { %1205 = vmatpush3.bf16.msra.mxu0 %v1454_v8  ;;  %1271 = vmatpush3.bf16.msra.mxu1 %v1454_v8 }
  0xe1   : > { %1206 = vmatprep.subr.bf16.mxu0 %v1455_v9  ;;  %1264 = vmatprep.subr.bf16.mxu1 %v1455_v9 }
  0xe4   : > { %1207 = vmatpush3.bf16.msra.mxu0 %v1455_v9  ;;  %1272 = vmatpush3.bf16.msra.mxu1 %v1455_v9 }
  0xe5   : > { %1208 = vmatprep.subr.bf16.mxu0 %v1456_v10  ;;  %1265 = vmatprep.subr.bf16.mxu1 %v1456_v10 }
  0xe8   : > { %1209 = vmatpush3.bf16.msra.mxu0 %v1456_v10  ;;  %1273 = vmatpush3.bf16.msra.mxu1 %v1456_v10 }
  0xe9   : > { %1226 = vmatprep.subr.bf16.mxu0 (!%p1066_p10), %v1465_v1  ;;  %1274 = vmatprep.subr.bf16.mxu1 (!%p1066_p10), %v1465_v1 }
  0xeb   : > { %1211 = vmatmul.mubr.bf16.vlgmr.msra.gmra.mrb[0].mxu0 %v1459_v11  ;;  %1219 = vmatmul.mubr.bf16.vlgmr.msra.gmra.mrb[0].mxu1 %v1460_v12  ;;  %v1469_v11 = vld [vmem:[#allocation8 + $0x20] sm:$0xff] (!%p1066_p10)   ;;  %v1470_v12 = vld [vmem:[#allocation8 + $0x28] sm:$0xff] (!%p1066_p10)  }
  0xec   : > { %1214 = vmatprep.mubr.bf16.mxu0 %v1461_v13  ;;  %1222 = vmatprep.mubr.bf16.mxu1 %v1462_v14  ;;  %v1471_v13 = vld [vmem:[#allocation8 + $0x30] sm:$0xff] (!%p1066_p10)   ;;  %v1472_v14 = vld [vmem:[#allocation8 + $0x38] sm:$0xff] (!%p1066_p10)  }
  0xed   : > { %1227 = vmatpush3.bf16.msra.mxu0 (!%p1066_p10), %v1465_v1  ;;  %1282 = vmatpush3.bf16.msra.mxu1 (!%p1066_p10), %v1465_v1 }
  0xee   : > { %1228 = vmatprep.subr.bf16.mxu0 (!%p1066_p10), %v1466_v2  ;;  %1275 = vmatprep.subr.bf16.mxu1 (!%p1066_p10), %v1466_v2 }
  0xf1   : > { %1229 = vmatpush3.bf16.msra.mxu0 (!%p1066_p10), %v1466_v2  ;;  %1283 = vmatpush3.bf16.msra.mxu1 (!%p1066_p10), %v1466_v2 }
  0xf2   : > { %1230 = vmatprep.subr.bf16.mxu0 (!%p1066_p10), %v1467_v3  ;;  %1276 = vmatprep.subr.bf16.mxu1 (!%p1066_p10), %v1467_v3 }
  0xf3   : > { %1215 = vmatmul.mubr.bf16.gmra.mrb[4].mxu0 %v1463_v15  ;;  %1223 = vmatmul.mubr.bf16.gmra.mrb[4].mxu1 %v1464_v16 }
  0xf5   : > { %1231 = vmatpush3.bf16.msra.mxu0 (!%p1066_p10), %v1467_v3  ;;  %1284 = vmatpush3.bf16.msra.mxu1 (!%p1066_p10), %v1467_v3 }
  0xf6   : > { %1232 = vmatprep.subr.bf16.mxu0 (!%p1066_p10), %v1468_v4  ;;  %1277 = vmatprep.subr.bf16.mxu1 (!%p1066_p10), %v1468_v4 }
  0xf9   : > { %1233 = vmatpush3.bf16.msra.mxu0 (!%p1066_p10), %v1468_v4  ;;  %1285 = vmatpush3.bf16.msra.mxu1 (!%p1066_p10), %v1468_v4 }
  0xfa   : > { %1234 = vmatprep.subr.bf16.mxu0 (!%p1066_p10), %v1469_v11  ;;  %1278 = vmatprep.subr.bf16.mxu1 (!%p1066_p10), %v1469_v11 }
  0xfd   : > { %1235 = vmatpush3.bf16.msra.mxu0 (!%p1066_p10), %v1469_v11  ;;  %1286 = vmatpush3.bf16.msra.mxu1 (!%p1066_p10), %v1469_v11 }
  0xfe   : > { %1236 = vmatprep.subr.bf16.mxu0 (!%p1066_p10), %v1470_v12  ;;  %1279 = vmatprep.subr.bf16.mxu1 (!%p1066_p10), %v1470_v12 }
 0x101   : > { %1237 = vmatpush3.bf16.msra.mxu0 (!%p1066_p10), %v1470_v12  ;;  %1287 = vmatpush3.bf16.msra.mxu1 (!%p1066_p10), %v1470_v12 }
 0x102   : > { %1238 = vmatprep.subr.bf16.mxu0 (!%p1066_p10), %v1471_v13  ;;  %1280 = vmatprep.subr.bf16.mxu1 (!%p1066_p10), %v1471_v13 }
 0x105   : > { %1239 = vmatpush3.bf16.msra.mxu0 (!%p1066_p10), %v1471_v13  ;;  %1288 = vmatpush3.bf16.msra.mxu1 (!%p1066_p10), %v1471_v13 }
 0x106   : > { %1240 = vmatprep.subr.bf16.mxu0 (!%p1066_p10), %v1472_v14  ;;  %1281 = vmatprep.subr.bf16.mxu1 (!%p1066_p10), %v1472_v14 }
 0x109   : > { %1241 = vmatpush3.bf16.msra.mxu0 (!%p1066_p10), %v1472_v14  ;;  %1289 = vmatpush3.bf16.msra.mxu1 (!%p1066_p10), %v1472_v14 }
 0x1be   : > { %v1212_v21 = vpop.f32.mrb[0].mxu0  ;;  %v1220_v22 = vpop.f32.mrb[0].mxu1 }
 0x1bf   : > { %v566_v25 = vadd.f32 %v1212_v21, %v325_v17  ;;  %v574_v26 = vadd.f32 %v1220_v22, %v333_v18  ;;  %v501_v27 = vpop.f32.mrb[1].mxu0  ;;  %v533_v28 = vpop.f32.mrb[1].mxu1 }
 0x1c0   : > { %v564_v31 = vadd.f32 %v501_v27, %v323_v19  ;;  %v572_v32 = vadd.f32 %v533_v28, %v331_v20  ;;  %v1213_v33 = vpop.f32.mrb[2].mxu0  ;;  %v1221_v34 = vpop.f32.mrb[2].mxu1 }
 0x1c1   : > { %582 = vst [vmem:[#allocation2 + $0x10] sm:$0xff] %v566_v25  ;;  %590 = vst [vmem:[#allocation2 + $0x50] sm:$0xff] %v574_v26  ;;  %v567_v35 = vadd.f32 %v1213_v33, %v326_v23  ;;  %v575_v36 = vadd.f32 %v1221_v34, %v334_v24  ;;  %v504_v37 = vpop.f32.mrb[3].mxu0  ;;  %v536_v38 = vpop.f32.mrb[3].mxu1  ;;  %v1067_v33 = vld [vmem:[#allocation9] ss:$0 sm:$0xff] (!%p1066_p10) }
 0x1c2   : > { %580 = vst [vmem:[#allocation2] sm:$0xff] %v564_v31  ;;  %588 = vst [vmem:[#allocation2 + $0x40] sm:$0xff] %v572_v32  ;;  %v565_v39 = vadd.f32 %v504_v37, %v324_v29  ;;  %v573_v40 = vadd.f32 %v536_v38, %v332_v30 }
 0x1c3   : > { %583 = vst [vmem:[#allocation2 + $0x18] sm:$0xff] %v567_v35  ;;  %591 = vst [vmem:[#allocation2 + $0x58] sm:$0xff] %v575_v36 }
 0x1c4   : > { %581 = vst [vmem:[#allocation2 + $0x8] sm:$0xff] %v565_v39  ;;  %589 = vst [vmem:[#allocation2 + $0x48] sm:$0xff] %v573_v40 }
 0x1c6   : > { %v1216_v45 = vpop.f32.mrb[4].mxu0  ;;  %v1224_v46 = vpop.f32.mrb[4].mxu1  ;;  %599 = sbr.rel (%p1066_p10) target bundleno = 694 (0x2b6), region = 60 }
 0x1c7   : > { %v570_v49 = vadd.f32 %v1216_v45, %v329_v41  ;;  %v578_v50 = vadd.f32 %v1224_v46, %v337_v42  ;;  %v517_v51 = vpop.f32.mrb[5].mxu0  ;;  %v549_v52 = vpop.f32.mrb[5].mxu1 }
 0x1c8   : > { %v568_v55 = vadd.f32 %v517_v51, %v327_v43  ;;  %v576_v56 = vadd.f32 %v549_v52, %v335_v44  ;;  %v1217_v57 = vpop.f32.mrb[6].mxu0  ;;  %v1225_v58 = vpop.f32.mrb[6].mxu1  ;;  %v602_v15 = vld [vmem:[#allocation2 + $0x10] sm:$0xff] (!%p1066_p10) }
 0x1c9   : > { %586 = vst [vmem:[#allocation2 + $0x30] sm:$0xff] %v570_v49  ;;  %594 = vst [vmem:[#allocation2 + $0x70] sm:$0xff] %v578_v50  ;;  %v571_v59 = vadd.f32 %v1217_v57, %v330_v47  ;;  %v579_v60 = vadd.f32 %v1225_v58, %v338_v48  ;;  %v520_v61 = vpop.f32.mrb[7].mxu0  ;;  %v552_v62 = vpop.f32.mrb[7].mxu1  ;;  %v600_v5 = vld [vmem:[#allocation2] sm:$0xff] (!%p1066_p10)  ;;  %v610_v17 = vld [vmem:[#allocation2 + $0x50] sm:$0xff] (!%p1066_p10) }
 0x1ca   : > { %584 = vst [vmem:[#allocation2 + $0x20] sm:$0xff] %v568_v55  ;;  %592 = vst [vmem:[#allocation2 + $0x60] sm:$0xff] %v576_v56  ;;  %v569_v63 = vadd.f32 %v520_v61, %v328_v53  ;;  %v577_v0 = vadd.f32 %v552_v62, %v336_v54  ;;  %v608_v7 = vld [vmem:[#allocation2 + $0x40] sm:$0xff] (!%p1066_p10)  ;;  %v603_v16 = vld [vmem:[#allocation2 + $0x18] sm:$0xff] (!%p1066_p10) }
 0x1cb   : > { %587 = vst [vmem:[#allocation2 + $0x38] sm:$0xff] %v571_v59  ;;  %595 = vst [vmem:[#allocation2 + $0x78] sm:$0xff] %v579_v60  ;;  %v601_v6 = vld [vmem:[#allocation2 + $0x8] sm:$0xff] (!%p1066_p10)  ;;  %v611_v18 = vld [vmem:[#allocation2 + $0x58] sm:$0xff] (!%p1066_p10)  ;;  %v617_v23 = vpack.c.bf16 (!%p1066_p10), %v603_v16, %v602_v15 }
 0x1cc   : > { %585 = vst [vmem:[#allocation2 + $0x28] sm:$0xff] %v569_v63  ;;  %593 = vst [vmem:[#allocation2 + $0x68] sm:$0xff] %v577_v0  ;;  %v616_v8 = vpack.c.bf16 (!%p1066_p10), %v601_v6, %v600_v5  ;;  %v609_v9 = vld [vmem:[#allocation2 + $0x48] sm:$0xff] (!%p1066_p10)  ;;  %v621_v24 = vpack.c.bf16 (!%p1066_p10), %v611_v18, %v610_v17 }
 0x1cd   : > { %v620_v10 = vpack.c.bf16 %v609_v9, %v608_v7 }
 0x1ce   : > { %1242 = vmatprep.mubr.bf16.mxu0 %v616_v8 }
 0x1cf   : > { %1250 = vmatprep.mubr.bf16.mxu1 %v620_v10  ;;  %1243 = vmatmul.mubr.bf16.vlgmr.msra.gmra.mrb[0].mxu0 %v617_v23 }
 0x1d0   : > { %1251 = vmatmul.mubr.bf16.vlgmr.msra.gmra.mrb[0].mxu1 %v621_v24  ;;  %v606_v27 = vld [vmem:[#allocation2 + $0x30] sm:$0xff] }
 0x1d1   : > { %v604_v19 = vld [vmem:[#allocation2 + $0x20] sm:$0xff]  ;;  %v614_v29 = vld [vmem:[#allocation2 + $0x70] sm:$0xff] }
 0x1d2   : > { %v612_v21 = vld [vmem:[#allocation2 + $0x60] sm:$0xff]  ;;  %v607_v28 = vld [vmem:[#allocation2 + $0x38] sm:$0xff] }
 0x1d3   : > { %v605_v20 = vld [vmem:[#allocation2 + $0x28] sm:$0xff]  ;;  %v615_v30 = vld [vmem:[#allocation2 + $0x78] sm:$0xff]  ;;  %v619_v31 = vpack.c.bf16 %v607_v28, %v606_v27 }
 0x1d4   : > { %v613_v22 = vld [vmem:[#allocation2 + $0x68] sm:$0xff]  ;;  %v618_v25 = vpack.c.bf16 %v605_v20, %v604_v19  ;;  %v623_v32 = vpack.c.bf16 %v615_v30, %v614_v29 }
 0x1d5   : > { %v622_v26 = vpack.c.bf16 %v613_v22, %v612_v21 }
 0x1d6   : > { %1246 = vmatprep.mubr.bf16.mxu0 %v618_v25 }
 0x1d7   : > { %1254 = vmatprep.mubr.bf16.mxu1 %v622_v26  ;;  %1247 = vmatmul.mubr.bf16.gmra.mrb[4].mxu0 %v619_v31 }
 0x1d8   : > { %1255 = vmatmul.mubr.bf16.gmra.mrb[4].mxu1 %v623_v32 }
 0x2a2   : > { %v1244_v34 = vpop.f32.mrb[0].mxu0 }
 0x2a3   : > { %v1252_v35 = vpop.f32.mrb[0].mxu1  ;;  %v738_v36 = vadd.f32 %v1244_v34, %v1067_v33  ;;  %v729_v38 = vpop.f32.mrb[1].mxu0 }
 0x2a4   : > { %v770_v37 = vadd.f32 %v1252_v35, %v1067_v33  ;;  %v761_v39 = vpop.f32.mrb[1].mxu1  ;;  %v730_v40 = vadd.f32 %v1067_v33, %v729_v38  ;;  %v1245_v42 = vpop.f32.mrb[2].mxu0 }
 0x2a5   : > { %v762_v41 = vadd.f32 %v1067_v33, %v761_v39  ;;  %v1253_v43 = vpop.f32.mrb[2].mxu1  ;;  %v741_v44 = vadd.f32 %v1245_v42, %v1067_v33  ;;  %v732_v46 = vpop.f32.mrb[3].mxu0  ;;  %v794_v50 = vmax.f32 %v738_v36, 0.0 }
 0x2a6   : > { %v773_v45 = vadd.f32 %v1253_v43, %v1067_v33  ;;  %v764_v47 = vpop.f32.mrb[3].mxu1  ;;  %v733_v48 = vadd.f32 %v1067_v33, %v732_v46  ;;  %v802_v51 = vmax.f32 %v770_v37, 0.0  ;;  %v792_v54 = vmax.f32 %v730_v40, 0.0 }
 0x2a7   : > { %v765_v49 = vadd.f32 %v1067_v33, %v764_v47  ;;  %v795_v52 = vmax.f32 %v741_v44, 0.0  ;;  %v800_v55 = vmax.f32 %v762_v41, 0.0 }
 0x2a8   : > { %v803_v53 = vmax.f32 %v773_v45, 0.0  ;;  %v793_v56 = vmax.f32 %v733_v48, 0.0 }
 0x2a9   : > { %v801_v57 = vmax.f32 %v765_v49, 0.0  ;;  %v1123_v58 = vpack.c.bf16 %v795_v52, %v794_v50 }
 0x2aa   : > { %v1143_v59 = vpack.c.bf16 %v803_v53, %v802_v51  ;;  %v1118_v60 = vpack.c.bf16 %v793_v56, %v792_v54  ;;  %v1248_v62 = vpop.f32.mrb[4].mxu0 }
 0x2ab   : > { %v1138_v61 = vpack.c.bf16 %v801_v57, %v800_v55  ;;  %v1256_v63 = vpop.f32.mrb[4].mxu1  ;;  %1155 = vst [vmem:[%s2118_s12 + $0x8] sm:$0xff] %v1123_v58   ;;  %v754_v0 = vadd.f32 %v1248_v62, %v1067_v33  ;;  %v745_v2 = vpop.f32.mrb[5].mxu0 }
 0x2ac   : > { %1159 = vst [vmem:[%s2118_s12 + $0x28] sm:$0xff] %v1143_v59   ;;  %v786_v1 = vadd.f32 %v1256_v63, %v1067_v33  ;;  %v777_v3 = vpop.f32.mrb[5].mxu1  ;;  %1119 = vst [vmem:[%s2118_s12] sm:$0xff] %v1118_v60   ;;  %v746_v4 = vadd.f32 %v1067_v33, %v745_v2  ;;  %v1249_v6 = vpop.f32.mrb[6].mxu0 }
 0x2ad   : > { %1158 = vst [vmem:[%s2118_s12 + $0x20] sm:$0xff] %v1138_v61   ;;  %v778_v5 = vadd.f32 %v1067_v33, %v777_v3  ;;  %v1257_v7 = vpop.f32.mrb[6].mxu1  ;;  %v757_v8 = vadd.f32 %v1249_v6, %v1067_v33  ;;  %v748_v10 = vpop.f32.mrb[7].mxu0  ;;  %v798_v14 = vmax.f32 %v754_v0, 0.0 }
 0x2ae   : > { %v789_v9 = vadd.f32 %v1257_v7, %v1067_v33  ;;  %v780_v11 = vpop.f32.mrb[7].mxu1  ;;  %v749_v12 = vadd.f32 %v1067_v33, %v748_v10  ;;  %v806_v15 = vmax.f32 %v786_v1, 0.0  ;;  %v796_v18 = vmax.f32 %v746_v4, 0.0 }
 0x2af   : > { %v781_v13 = vadd.f32 %v1067_v33, %v780_v11  ;;  %v799_v16 = vmax.f32 %v757_v8, 0.0  ;;  %v804_v19 = vmax.f32 %v778_v5, 0.0 }
 0x2b0   : > { %v807_v17 = vmax.f32 %v789_v9, 0.0  ;;  %v797_v20 = vmax.f32 %v749_v12, 0.0 }
 0x2b1   : > { %v805_v21 = vmax.f32 %v781_v13, 0.0  ;;  %v1133_v22 = vpack.c.bf16 %v799_v16, %v798_v14 }
 0x2b2   : > { %v1153_v23 = vpack.c.bf16 %v807_v17, %v806_v15  ;;  %v1128_v24 = vpack.c.bf16 %v797_v20, %v796_v18 }
 0x2b3   : > { %v1148_v25 = vpack.c.bf16 %v805_v21, %v804_v19  ;;  %1157 = vst [vmem:[%s2118_s12 + $0x18] sm:$0xff] %v1133_v22  }
 0x2b4   : > { %1161 = vst [vmem:[%s2118_s12 + $0x38] sm:$0xff] %v1153_v23   ;;  %1156 = vst [vmem:[%s2118_s12 + $0x10] sm:$0xff] %v1128_v24  }
 0x2b5   : > { %1160 = vst [vmem:[%s2118_s12 + $0x30] sm:$0xff] %v1148_v25  }
 0x2b6 PF: > { %s2301_s24 = sld [smem:[#allocation20_spill]]  ;;  %s2303_s11 = sld [smem:[#allocation23_spill]] }
 0x2b7   : > { %s2304_s4 = sld [smem:[#allocation28_spill]]  ;;  %s902_s16 = sshll.u32 %s2118_s12, 4  ;;  %s2153_s16 = int_to_ptr.vmem [resolvable:$true] %s902_s16 }
 0x2b8   : > { %s2157_s10 = scalar_lea.sflag [#allocation5], %s296_s29  ;;  %s1589_s8 = scalar_lea.vmem %s2153_s16, 1024 }
 0x2b9   : > { %p1590_p7 = scmp.ne.s32.totalorder %s2153_s16, %s1589_s8  ;;  %s1757_s6 = smov [#allocation11]  }
 0x2ba   : > { %s1593_s2 = sshll.u32 %s1757_s6, 4  ;;  %s1594_s2 = int_to_ptr.vmem [resolvable:$false] %s1593_s2 }
 0x2bb   : > { %s1595_s3 = scalar_lea.vmem %s1594_s2, 2048  ;;  %p1596_p12 = scmp.lt.s32.totalorder %s2153_s16, %s1594_s2 }
 0x2bc   : > { %s1114_s30 = sshll.u32 %s2301_s24, 10  ;;  %p2305_p0 = scmp.ne.s32.totalorder %s2303_s11, 0 }
 0x2bd   : > { %s2150_s21 = scalar_lea.hbm %s2304_s4, %s1114_s30  ;;  %p1597_p5 = scmp.lt.s32.totalorder %s1595_s3, %s1589_s8 }
 0x2be   : > { %p1591_p13 = pnand %p1590_p7, %p2305_p0 }
 0x2bf   : > { %p1598_p4 = por %p1597_p5, %p1596_p12 }
 0x2c0   : > { %p1592_p8 = pneg %p1591_p13 }
 0x2c2   : > { %p1599_p9 = pnand %p1598_p4, %p1592_p8 }
 0x2c4   : > { %1602 = shalt.err (!%p1599_p9)
}
 0x2c5   : > { %s1603_s29 = scalar_lea.hbm %s2150_s21, 1024  ;;  %s1607_s24 = scalar_lea.hbm %s2304_s4, 5120 }
 0x2c6   : > { %p1604_p6 = scmp.ne.s32.totalorder %s2150_s21, %s1603_s29  ;;  %p1608_p3 = scmp.lt.u32.totalorder %s2150_s21, %s2304_s4 }
 0x2c7   : > { %p1609_p11 = scmp.lt.u32.totalorder %s1607_s24, %s1603_s29  ;;  %p1611_p7 = scmp.lt.u32.totalorder %s1603_s29, %s2150_s21 }
 0x2c8   : > { %p1605_p1 = pnand %p1604_p6, %p2305_p0 }
 0x2c9   : > { %p1610_p10 = por %p1609_p11, %p1608_p3 }
 0x2ca   : > { %p1606_p2 = pneg %p1605_p1 }
 0x2cb   : > { %p1612_p13 = por %p1611_p7, %p1610_p10 }
 0x2cd   : > { %p1613_p8 = pnand %p1612_p13, %p1606_p2 }
 0x2cf   : > { %1616 = shalt.err (!%p1613_p8)
}
 0x2d0   : > { %s1758_s5 = smov 64   ;;  %s1759_s14 = smov 4  }
 0x2d1   : > { %1303 = dma.vmem_to_hbm [thread:$0]  (%p2305_p0), %s2153_s16, 1024, %s2150_s21, %s2157_s10, %s1758_s5, %s1758_s5, %s1759_s14  }
 0x2d2 PF: > { %s2306_s8 = sld [smem:[#allocation17_spill]]  ;;  %s2307_s6 = sld [smem:[#allocation24_spill]] }
 0x2d3   : > { %p1328_p12 = scmp.ge.s32.totalorder %s1747_s28, 2 }
 0x2d8   : > { %s917_s2 = sand.u32 1, %s2306_s8   ;;  %p2308_p5 = scmp.ne.s32.totalorder %s2307_s6, 0 }
 0x2d9   : > { %s918_s3 = scalar_lea.sflag [#allocation5], %s917_s2 }
 0x2da   : > { %p1320_p4 = pnand %p1328_p12, %p2308_p5 }
 0x2dc   : > { %1690 = dma.done.wait (!%p1320_p4), %s918_s3, 1024  }
 0x2dd   : > { %1692 = vsyncadd (!%p1320_p4), %s918_s3, 4294966272  ;;  %s24_s28 = sadd.s32 1, %s1747_s28   ;;  %s2310_s12 = sld [smem:[#allocation18_spill]] }
 0x2de   : > { %p2186_p9 = scmp.ge.s32.totalorder %s24_s28, 27   ;;  %s2311_s11 = sld [smem:[#allocation25_spill]] }
 0x2df   : > { %s2312_s10 = smov %s2331_s15  ;;  %s2314_s16 = smov %s1703_s17 }
 0x2e0   : > { %s2315_s17 = smov %s1982_s25  ;;  %s2316_s18 = smov %s1711_s19 }
 0x2e1   : > { %s2317_s19 = smov %s1715_s20  ;;  %s2318_s20 = smov %s2039_s13 }
 0x2e2   : > { %s2319_s21 = smov %s1723_s22  ;;  %s2320_s22 = smov %s1727_s23 }
 0x2e3   : > { %s2313_s15 = smov %s2310_s12  ;;  %s2321_s23 = smov %s1985_s9 }
 0x2e4   : > { %s2322_s24 = smov %s1739_s26  ;;  %s2323_s25 = smov %s1743_s27 }
 0x2e5   : > { %s2324_s26 = smov %s2311_s11  ;;  %s2325_s27 = smov %s2312_s10 }
 0x2e6   :  { %23 = sbr.rel (!%p2186_p9) target bundleno = 17 (0x11), region = 110 }
 0x2ed   :  { %923 = vsyncpa [#allocation4], 1 }
 0x2ee   :  { %925 = vsyncpa [#allocation4 + $0x1], 1 }
 0x2ef   :  { %926 = vsyncpa [#allocation7], 1 }
 0x2f0   :  { %928 = vsyncpa [#allocation7 + $0x1], 1 }
 0x2f1   :  { %929 = vsyncpa [#allocation10], 1 }
 0x2f2   :  { %930 = vsyncpa [#allocation5], 1 }
 0x2f3   :  { %932 = vsyncpa [#allocation5 + $0x1], 1 }

// kernel: _forward_impl.3
= control target key start
LH: loop header
LB: loop body
LE: loop exit
PB: predicated region body
PF: predicated region fallthrough
CT: control target
= control target key end

     0   :  { %s2572_s0 = inlined_call_operand.hbm [shape: bf16[640,640], index: 0, kind: input, shape index: {}]   ;;  %s2573_s1 = inlined_call_operand.hbm [shape: bf16[640,128], index: 1, kind: input, shape index: {}]   ;;  %s2574_s2 = inlined_call_operand.hbm [shape: bf16[128,128], index: 2, kind: input, shape index: {}]   ;;  %s2575_s3 = inlined_call_operand.hbm [shape: f32[1,128], index: 3, kind: input, shape index: {}]   ;;  %s2576_s4 = inlined_call_operand.hbm [shape: bf16[128,128], index: 4, kind: input, shape index: {}]   ;;  %s2577_s5 = inlined_call_operand.hbm [shape: f32[1,128], index: 5, kind: input, shape index: {}]   ;;  %s2578_s6 = inlined_call_operand.hbm [shape: f32[640,128], index: 6, kind: output, shape index: {}]  }
   0x1   :  { %2603 = sst [smem:[#allocation30_spill]] %s2574_s2 }
   0x2   :  { %2604 = sst [smem:[#allocation31_spill]] %s2575_s3 }
   0x3   :  { %2605 = sst [smem:[#allocation32_spill]] %s2576_s4 }
   0x4   :  { %2606 = sst [smem:[#allocation33_spill]] %s2577_s5 }
   0x5   :  { %2607 = sst [smem:[#allocation34_spill]] %s2578_s6 }
   0x6   :  { %11 = vsyncpa [#allocation4], 0 }
   0x7   :  { %13 = vsyncpa [#allocation4 + $0x1], 0 }
   0x8   :  { %14 = vsyncpa [#allocation7], 0 }
   0x9   :  { %16 = vsyncpa [#allocation7 + $0x1], 0 }
   0xa   :  { %17 = vsyncpa [#allocation10], 0 }
   0xb   :  { %18 = vsyncpa [#allocation13], 0 }
   0xc   :  { %19 = vsyncpa [#allocation5], 0 }
   0xd   :  { %21 = vsyncpa [#allocation5 + $0x1], 0  ;;  %s2063_s21 = smov 0   ;;  %s2065_s22 = smov 0  }
   0xe   :  { %s2067_s23 = smov 0   ;;  %s2069_s24 = smov 0  }
   0xf   :  { %s2071_s25 = smov 0   ;;  %s2073_s26 = smov 0  }
  0x10   :  { %s2075_s27 = smov 0   ;;  %s2077_s28 = smov 0  }
  0x11   :  { %s2079_s29 = smov 0   ;;  %s2081_s30 = smov 0  }
  0x12   :  { %s2083_s7 = smov 0   ;;  %s2085_s8 = smov 0  }
  0x13   :  { %s2087_s9 = smov 0   ;;  %s2089_s10 = smov 0  }
  0x14 LB: > { %2608 = sst [smem:[#allocation21_spill]] %s1961_s21  ;;  %s2130_s11 = sadd.s32 4294967295, %s2013_s10   ;;  %s2013_s10 = sphi %s2089_s10, %s27_s10   ;;  %s2009_s9 = sphi %s2087_s9, %s2674_s9   ;;  %s2005_s8 = sphi %s2085_s8, %s2673_s8   ;;  %s2001_s7 = sphi %s2083_s7, %s2672_s7   ;;  %s1997_s30 = sphi %s2081_s30, %s2671_s30   ;;  %s1993_s29 = sphi %s2079_s29, %s2670_s29   ;;  %s1989_s28 = sphi %s2077_s28, %s2669_s28   ;;  %s1985_s27 = sphi %s2075_s27, %s2668_s27   ;;  %s1981_s26 = sphi %s2073_s26, %s2667_s26   ;;  %s1977_s25 = sphi %s2071_s25, %s2666_s25   ;;  %s1973_s24 = sphi %s2069_s24, %s2665_s24   ;;  %s1969_s23 = sphi %s2067_s23, %s2664_s23   ;;  %s1965_s22 = sphi %s2065_s22, %s2663_s22   ;;  %s1961_s21 = sphi %s2063_s21, %s2660_s21  }
  0x15   : > { %2609 = sst [smem:[#allocation22_spill]] %s1965_s22  ;;  %s1243_s12 = sadd.s32 4294967294, %s2013_s10  }
  0x16   : > { %2610 = sst [smem:[#allocation23_spill]] %s1997_s30  ;;  %p61_p0 = scmp.ne.s32.totalorder %s1989_s28, %s1985_s27 }
  0x17   : > { %2611 = sst [smem:[#allocation24_spill]] %s2001_s7  ;;  %p2584_p1 = scmp.eq.s32.totalorder %s2130_s11, 0 }
  0x18   : > { %2612 = sst [smem:[#allocation25_spill]] %s2130_s11  ;;  %p87_p2 = scmp.ne.s32.totalorder %s1977_s25, %s1973_s24 }
  0x19   : > { %p2139_p3 = por %p2584_p1, %p61_p0  ;;  %p194_p4 = scmp.ne.s32.totalorder %s1969_s23, %s1965_s22 }
  0x1a   : > { %p2147_p5 = por %p87_p2, %p2584_p1  ;;  %p195_p6 = scmp.eq.s32.totalorder %s2130_s11, 24 }
  0x1b   : > { %s2613_s14 = scalar_select %p2139_p3, 1, 0 }
  0x1c   : > { %s2615_s15 = scalar_select %p2147_p5, 1, 0 }
  0x1d   : > { %2614 = sst [smem:[#allocation26_spill]] %s2613_s14  ;;  %p200_p7 = scmp.ne.s32.totalorder %s1965_s22, %s1961_s21 }
  0x1e   : > { %2616 = sst [smem:[#allocation27_spill]] %s2615_s15  ;;  %p201_p8 = scmp.eq.s32.totalorder %s1243_s12, 24 }
  0x1f   : > { %p2154_p9 = por %p195_p6, %p194_p4  ;;  %p1244_p10 = scmp.ge.s32.totalorder %s2013_s10, 1 }
  0x20   : > { %p2159_p11 = por %p201_p8, %p200_p7  ;;  %p208_p12 = scmp.lt.s32.totalorder %s2013_s10, 26 }
  0x21   : > { %s2617_s16 = scalar_select %p2154_p9, 1, 0 }
  0x22   : > { %s2619_s17 = scalar_select %p2159_p11, 1, 0 }
  0x23   : > { %2618 = sst [smem:[#allocation28_spill]] %s2617_s16  ;;  %p2164_p13 = pnand %p1244_p10, %p208_p12 }
  0x24   : > { %2620 = sst [smem:[#allocation29_spill]] %s2619_s17  ;;  %s2015_s19 = smov [#allocation8]  }
  0x25   : > { %s2621_s18 = scalar_select %p2164_p13, 1, 0 }
  0x26   : > { %s220_s20 = sshll.u32 %s2015_s19, 4  ;;  %p1491_p0 = pneg %p2164_p13  ;;  %s2168_s20 = int_to_ptr.vmem [resolvable:$true] %s220_s20 }
  0x27   : > { %s2016_s27 = smov [#allocation9]   ;;  %s2017_s13 = smov [#allocation11]  }
  0x28   : > { %p2174_p2 = pnand %p1491_p0, %p2584_p1  ;;  %s234_s12 = sshll.u32 %s2016_s27, 4  ;;  %s2178_s12 = int_to_ptr.vmem [resolvable:$true] %s234_s12 }
  0x29   : > { %s2180_s17 = sshll.u32 %s2017_s13, 4  ;;  %s2623_s2 = sld [smem:[#allocation30_spill]]  ;;  %s245_s17 = int_to_ptr.vmem [resolvable:$true] %s2180_s17 }
  0x2a   : > { %p2190_p6 = pneg %p2174_p2 }
  0x2f   : > { %s1679_s19 = scalar_lea.hbm %s2623_s2, 1024 }
  0x30   : > { %p1680_p4 = scmp.ne.s32.totalorder %s2623_s2, %s1679_s19  ;;  %p1686_p10 = scmp.lt.u32.totalorder %s1679_s19, %s2623_s2 }
  0x32   : > { %p1682_p7 = pnand %p2190_p6, %p1680_p4 }
  0x34   : > { %p1683_p8 = pneg %p1682_p7 }
  0x36   : > { %p1688_p12 = pnand %p1686_p10, %p1683_p8 }
  0x38   : > { %1691 = shalt.err (!%p1688_p12)
}
  0x39   : > { %s1692_s6 = scalar_lea.vmem %s2168_s20, 1024  ;;  %p1700_p9 = scmp.lt.s32.totalorder %s2168_s20, %s2168_s20 }
  0x3a   : > { %p1693_p0 = scmp.ne.s32.totalorder %s2168_s20, %s1692_s6  ;;  %p1701_p5 = scmp.lt.s32.totalorder %s1692_s6, %s1692_s6 }
  0x3c   : > { %p1695_p1 = pnand %p1693_p0, %p2190_p6  ;;  %p1702_p4 = por %p1701_p5, %p1700_p9 }
  0x3e   : > { %p1696_p11 = pneg %p1695_p1 }
  0x40   : > { %p1703_p7 = pnand %p1702_p4, %p1696_p11 }
  0x42   : > { %1706 = shalt.err (!%p1703_p7)
}
  0x43   : > { %s2597_s21 = smov 64   ;;  %s2599_s7 = smov 4  }
  0x44   : > { %1494 = dma.hbm_to_vmem [thread:$0]  (!%p2174_p2), %s2623_s2, 1024, %s2168_s20, [#allocation7], %s2597_s21, %s2597_s21, %s2599_s7  }
  0x45   : > { %s2625_s3 = sld [smem:[#allocation31_spill]] }
  0x4b   : > { %s1707_s6 = scalar_lea.hbm %s2625_s3, 16 }
  0x4c   : > { %p1708_p1 = scmp.ne.s32.totalorder %s2625_s3, %s1707_s6  ;;  %p1714_p11 = scmp.lt.u32.totalorder %s1707_s6, %s2625_s3 }
  0x4e   : > { %p1710_p5 = pnand %p1708_p1, %p2190_p6 }
  0x50   : > { %p1711_p9 = pneg %p1710_p5 }
  0x52   : > { %p1716_p8 = pnand %p1714_p11, %p1711_p9 }
  0x54   : > { %1719 = shalt.err (!%p1716_p8)
}
  0x55   : > { %s1720_s20 = scalar_lea.vmem %s2178_s12, 16  ;;  %s1727_s22 = scalar_lea.vmem %s2178_s12, 32 }
  0x56   : > { %p1721_p10 = scmp.ne.s32.totalorder %s2178_s12, %s1720_s20  ;;  %p1728_p4 = scmp.lt.s32.totalorder %s2178_s12, %s2178_s12 }
  0x57   : > { %p1729_p7 = scmp.lt.s32.totalorder %s1727_s22, %s1720_s20 }
  0x58   : > { %p1723_p12 = pnand %p1721_p10, %p2190_p6 }
  0x59   : > { %p1730_p1 = por %p1729_p7, %p1728_p4 }
  0x5a   : > { %p1724_p0 = pneg %p1723_p12 }
  0x5c   : > { %p1731_p5 = pnand %p1730_p1, %p1724_p0 }
  0x5e   : > { %1734 = shalt.err (!%p1731_p5)
}
  0x5f   : > { %1497 = dma.hbm_to_vmem [thread:$0]  (!%p2174_p2), %s2625_s3, 16, %s2178_s12, [#allocation10]  }
  0x60   : > { %s2626_s4 = sld [smem:[#allocation32_spill]] }
  0x66   : > { %s1735_s19 = scalar_lea.hbm %s2626_s4, 1024 }
  0x67   : > { %p1736_p9 = scmp.ne.s32.totalorder %s2626_s4, %s1735_s19  ;;  %p1742_p10 = scmp.lt.u32.totalorder %s1735_s19, %s2626_s4 }
  0x69   : > { %p1738_p11 = pnand %p1736_p9, %p2190_p6 }
  0x6b   : > { %p1739_p8 = pneg %p1738_p11 }
  0x6d   : > { %p1744_p12 = pnand %p1742_p10, %p1739_p8 }
  0x6f   : > { %1747 = shalt.err (!%p1744_p12)
}
  0x70   : > { %s1748_s22 = scalar_lea.vmem %s245_s17, 1024  ;;  %p1756_p1 = scmp.lt.s32.totalorder %s245_s17, %s245_s17 }
  0x71   : > { %p1749_p0 = scmp.ne.s32.totalorder %s245_s17, %s1748_s22  ;;  %p1757_p5 = scmp.lt.s32.totalorder %s1748_s22, %s1748_s22 }
  0x73   : > { %p1751_p4 = pnand %p1749_p0, %p2190_p6  ;;  %p1758_p3 = por %p1757_p5, %p1756_p1 }
  0x75   : > { %p1752_p7 = pneg %p1751_p4 }
  0x77   : > { %p1759_p13 = pnand %p1758_p3, %p1752_p7 }
  0x79   : > { %1762 = shalt.err (!%p1759_p13)
}
  0x7a   : > { %1500 = dma.hbm_to_vmem [thread:$0]  (!%p2174_p2), %s2626_s4, 1024, %s245_s17, [#allocation10], %s2597_s21, %s2597_s21, %s2599_s7  }
  0x7b   : > { %s2020_s14 = smov [#allocation12]   ;;  %s2627_s5 = sld [smem:[#allocation33_spill]] }
  0x7c   : > { %s258_s15 = sshll.u32 %s2020_s14, 4  ;;  %s259_s15 = int_to_ptr.vmem [resolvable:$true] %s258_s15 }
  0x81   : > { %s1763_s27 = scalar_lea.hbm %s2627_s5, 16 }
  0x82   : > { %p1764_p3 = scmp.ne.s32.totalorder %s2627_s5, %s1763_s27  ;;  %p1770_p11 = scmp.lt.u32.totalorder %s1763_s27, %s2627_s5 }
  0x84   : > { %p1766_p13 = pnand %p1764_p3, %p2190_p6 }
  0x86   : > { %p1767_p9 = pneg %p1766_p13 }
  0x88   : > { %p1772_p8 = pnand %p1770_p11, %p1767_p9 }
  0x8a   : > { %1775 = shalt.err (!%p1772_p8)
}
  0x8b   : > { %s1776_s17 = scalar_lea.vmem %s259_s15, 16  ;;  %s1783_s12 = scalar_lea.vmem %s259_s15, 32 }
  0x8c   : > { %p1777_p10 = scmp.ne.s32.totalorder %s259_s15, %s1776_s17  ;;  %p1784_p4 = scmp.lt.s32.totalorder %s259_s15, %s259_s15 }
  0x8d   : > { %p1785_p7 = scmp.lt.s32.totalorder %s1783_s12, %s1776_s17 }
  0x8e   : > { %p1779_p12 = pnand %p1777_p10, %p2190_p6 }
  0x8f   : > { %p1786_p1 = por %p1785_p7, %p1784_p4 }
  0x90   : > { %p1780_p0 = pneg %p1779_p12 }
  0x92   : > { %p1787_p5 = pnand %p1786_p1, %p1780_p0 }
  0x94   : > { %1790 = shalt.err (!%p1787_p5)
}
  0x95   : > { %1503 = dma.hbm_to_vmem [thread:$0]  (!%p2174_p2), %s2627_s5, 16, %s259_s15, [#allocation13]  }
  0x96   : > { %s36_s30 = sadd.s32 1, %s2005_s8  ;;  %s39_s16 = sadd.s32 1, %s2009_s9 }
  0x97   : > { %p37_p6 = scmp.ge.s32.totalorder %s36_s30, 5  ;;  %s48_s24 = sadd.s32 1, %s1993_s29 }
  0x98   : > { %p55_p3 = scmp.ne.s32.totalorder %s1993_s29, %s1989_s28  ;;  %p2602_p13 = scmp.eq.s32.totalorder %s2013_s10, 0 }
  0x99   : > { %s2676_s30 = smov (%p37_p6, %s36_s30), 0  ;;  %s2678_s16 = smov (!%p37_p6, %s39_s16), %s2009_s9 }
  0x9a   : > { %s2289_s19 = ssub.s32 %s2005_s8, %s2676_s30  ;;  %p2293_p2 = por %p2602_p13, %p55_p3 }
  0x9b   : > { %p41_p9 = scmp.ge.s32.totalorder %s2678_s16, 5  ;;  %p72_p11 = scmp.eq.s32.totalorder %s2289_s19, 0 }
  0x9c   : > { %p2601_p8 = scmp.lt.s32.totalorder %s2013_s10, 25  ;;  %s269_s27 = sand.u32 1, %s1993_s29  }
  0x9d   : > { %s2680_s16 = smov (%p41_p9, %s2678_s16), 0  ;;  %s1250_s13 = sshll.u32 %s269_s27, 6 }
  0x9e   : > { %s43_s6 = ssub.s32 %s2009_s9, %s2680_s16  ;;  %s1468_s22 = smul.u32 80, %s2009_s9 }
  0x9f   : > { %s45_s20 = sor.u32 %s2289_s19, %s43_s6  ;;  %p182_p10 = scmp.eq.s32.totalorder %s43_s6, 0 }
  0xa0   : > { %p46_p12 = scmp.eq.s32.totalorder %s45_s20, 0  ;;  %s2629_s17 = sadd.s32 1, %s1969_s23 }
  0xa1   : > { %s2309_s12 = scalar_select %p182_p10, %s1969_s23, %s2629_s17  }
  0xa2   : > { %s2312_s11 = scalar_select %p46_p12, %s1993_s29, %s48_s24  }
  0xa3   : > { %s279_s14 = sadd.s32 %s2005_s8, %s1468_s22  ;;  %s273_s21 = scalar_lea.vmem [#allocation3], %s1250_s13 }
  0xa4   : > { %s282_s7 = sshll.u32 %s273_s21, 4  ;;  %s1253_s2 = sshll.u32 %s279_s14, 6  ;;  %s2315_s7 = int_to_ptr.vmem [resolvable:$true] %s282_s7 }
  0xa5   : > { %s2320_s5 = scalar_lea.hbm %s2572_s0, %s1253_s2  ;;  %p2326_p0 = pnand %p2601_p8, %p2293_p2 }
  0xa6   : > { %s2330_s21 = scalar_lea.sflag [#allocation4], %s269_s27  ;;  %s1791_s13 = scalar_lea.hbm %s2320_s5, 1024 }
  0xa7   : > { %p1792_p4 = scmp.ne.s32.totalorder %s2320_s5, %s1791_s13  ;;  %p1793_p7 = pneg %p2326_p0 }
  0xa8   : > { %s1796_s4 = scalar_lea.hbm %s2572_s0, 25600  ;;  %p1797_p6 = scmp.lt.u32.totalorder %s2320_s5, %s2572_s0 }
  0xa9   : > { %p1794_p1 = pnand %p1793_p7, %p1792_p4  ;;  %p1798_p3 = scmp.lt.u32.totalorder %s1796_s4, %s1791_s13 }
  0xaa   : > { %p1800_p9 = scmp.lt.u32.totalorder %s1791_s13, %s2320_s5 }
  0xab   : > { %p1795_p5 = pneg %p1794_p1  ;;  %p1799_p2 = por %p1798_p3, %p1797_p6 }
  0xad   : > { %p1801_p10 = por %p1800_p9, %p1799_p2 }
  0xaf   : > { %p1802_p12 = pnand %p1801_p10, %p1795_p5 }
  0xb1   : > { %1805 = shalt.err (!%p1802_p12)
}
  0xb2   : > { %s1806_s27 = scalar_lea.vmem %s2315_s7, 1024  ;;  %s2021_s20 = smov [#allocation3]  }
  0xb3   : > { %p1807_p4 = scmp.ne.s32.totalorder %s2315_s7, %s1806_s27  ;;  %s1811_s22 = sshll.u32 %s2021_s20, 4  ;;  %s1812_s22 = int_to_ptr.vmem [resolvable:$false] %s1811_s22 }
  0xb4   : > { %s1813_s17 = scalar_lea.vmem %s1812_s22, 2048  ;;  %p1814_p13 = scmp.lt.s32.totalorder %s2315_s7, %s1812_s22 }
  0xb5   : > { %p1809_p1 = pnand %p1807_p4, %p1793_p7  ;;  %p1815_p6 = scmp.lt.s32.totalorder %s1813_s17, %s1806_s27 }
  0xb7   : > { %p1810_p8 = pneg %p1809_p1  ;;  %p1816_p3 = por %p1815_p6, %p1814_p13 }
  0xb9   : > { %p1817_p2 = pnand %p1816_p3, %p1810_p8 }
  0xbb   : > { %1820 = shalt.err (!%p1817_p2)
}
  0xbc   : > { %s2022_s14 = smov 320   ;;  %s2631_s13 = smov 4  }
  0xbd   : > { %s2632_s2 = smov 64   ;;  %s74_s3 = sadd.s32 1, %s1981_s26 }
  0xbe   : > { %1507 = dma.hbm_to_vmem [thread:$0]  (!%p2326_p0), %s2320_s5, 1024, %s2315_s7, %s2330_s21, %s2022_s14, %s2632_s2, %s2631_s13  }
  0xbf   : > { %p81_p13 = scmp.ne.s32.totalorder %s1981_s26, %s1977_s25  ;;  %p2633_p8 = scmp.eq.s32.totalorder %s2013_s10, 0 }
  0xc0   : > { %s2366_s24 = scalar_select %p72_p11, %s1981_s26, %s74_s3  }
  0xc1   : > { %p83_p7 = por %p81_p13, %p2633_p8  ;;  %s292_s4 = sand.u32 1, %s2013_s10  }
  0xc2   : > { %s294_s15 = sand.u32 1, %s1981_s26   ;;  %s1306_s27 = sshll.u32 %s2005_s8, 10 }
  0xc3   : > { %s1254_s6 = sshll.u32 %s294_s15, 6  ;;  %s2376_s17 = scalar_lea.hbm %s2573_s1, %s1306_s27 }
  0xc4   : > { %s296_s5 = scalar_lea.vmem [#allocation6], %s1254_s6  ;;  %p2634_p0 = scmp.lt.s32.totalorder %s2013_s10, 25 }
  0xc5   : > { %s303_s7 = sshll.u32 %s296_s5, 4  ;;  %s2386_s21 = scalar_lea.sflag [#allocation7], %s292_s4  ;;  %s2384_s7 = int_to_ptr.vmem [resolvable:$true] %s303_s7 }
  0xc6   : > { %p2380_p11 = pnand %p2634_p0, %p83_p7  ;;  %s1821_s14 = scalar_lea.hbm %s2376_s17, 1024 }
  0xc7   : > { %p1822_p5 = scmp.ne.s32.totalorder %s2376_s17, %s1821_s14  ;;  %s1826_s6 = scalar_lea.hbm %s2573_s1, 5120 }
  0xc8   : > { %p1823_p9 = pneg %p2380_p11  ;;  %p1827_p4 = scmp.lt.u32.totalorder %s2376_s17, %s2573_s1 }
  0xc9   : > { %p1828_p1 = scmp.lt.u32.totalorder %s1826_s6, %s1821_s14  ;;  %p1830_p3 = scmp.lt.u32.totalorder %s1821_s14, %s2376_s17 }
  0xca   : > { %p1824_p10 = pnand %p1823_p9, %p1822_p5 }
  0xcb   : > { %p1829_p6 = por %p1828_p1, %p1827_p4 }
  0xcc   : > { %p1825_p12 = pneg %p1824_p10 }
  0xcd   : > { %p1831_p2 = por %p1830_p3, %p1829_p6 }
  0xcf   : > { %p1832_p13 = pnand %p1831_p2, %p1825_p12 }
  0xd1   : > { %1835 = shalt.err (!%p1832_p13)
}
  0xd2   : > { %s1836_s4 = scalar_lea.vmem %s2384_s7, 1024  ;;  %s2023_s22 = smov [#allocation6]  }
  0xd3   : > { %p1837_p8 = scmp.ne.s32.totalorder %s2384_s7, %s1836_s4  ;;  %s1841_s5 = sshll.u32 %s2023_s22, 4  ;;  %s1842_s5 = int_to_ptr.vmem [resolvable:$false] %s1841_s5 }
  0xd4   : > { %s1843_s3 = scalar_lea.vmem %s1842_s5, 2048  ;;  %p1844_p5 = scmp.lt.s32.totalorder %s2384_s7, %s1842_s5 }
  0xd5   : > { %p1839_p7 = pnand %p1837_p8, %p1823_p9  ;;  %p1845_p10 = scmp.lt.s32.totalorder %s1843_s3, %s1836_s4 }
  0xd7   : > { %p1840_p0 = pneg %p1839_p7  ;;  %p1846_p4 = por %p1845_p10, %p1844_p5 }
  0xd9   : > { %p1847_p1 = pnand %p1846_p4, %p1840_p0 }
  0xdb   : > { %1850 = shalt.err (!%p1847_p1)
}
  0xdc   : > { %1510 = dma.hbm_to_vmem [thread:$0]  (!%p2380_p11), %s2376_s17, 1024, %s2384_s7, %s2386_s21, %s2632_s2, %s2632_s2, %s2631_s13  }
  0xdd   : > { %p2636_p9 = scmp.ne.s32.totalorder %s2621_s18, 0 }
  0xde   : > { %s2637_s14 = sld [smem:[#allocation26_spill]] (!%p2636_p9)  ;;  %s317_s15 = sand.u32 (!%p2636_p9), 1, %s1989_s28  }
  0xdf   : > { %315 = sbr.rel (%p2636_p9) target bundleno = 1019 (0x3fb), region = 44  ;;  %s1258_s6 = sshll.u32 (!%p2636_p9), %s317_s15, 6 }
  0xe0   : > { %s318_s27 = scalar_lea.sflag (!%p2636_p9), [#allocation4], %s317_s15  ;;  %s2420_s20 = scalar_lea.vmem (!%p2636_p9), [#allocation3], %s1258_s6 }
  0xe4   : > { %p2638_p12 = scmp.ne.s32.totalorder (!%p2636_p9), %s2637_s14, 0 }
  0xe6   : > { %1936 = dma.done.wait (%p2638_p12), %s318_s27, 1024  }
  0xe7   : > { %1938 = vsyncadd (%p2638_p12), %s318_s27, 4294966272  ;;  %s2639_s19 = sld [smem:[#allocation25_spill]]  ;;  %s2640_s4 = sld [smem:[#allocation27_spill]] }
  0xe8   : > { %s328_s13 = sand.u32 1, %s1977_s25  }
  0xe9   : > { %s1259_s2 = sshll.u32 %s328_s13, 6 }
  0xea   : > { %s2428_s17 = scalar_lea.vmem [#allocation6], %s1259_s2 }
  0xed   : > { %s326_s22 = sand.u32 1, %s2639_s19   ;;  %p2641_p11 = scmp.ne.s32.totalorder %s2640_s4, 0 }
  0xee   : > { %s327_s18 = scalar_lea.sflag [#allocation7], %s326_s22 }
  0xef   : > { %1940 = dma.done.wait (%p2641_p11), %s327_s18, 1024  }
  0xf0   : > { %1942 = vsyncadd (%p2641_p11), %s327_s18, 4294966272  ;;  %p2642_p6 = scmp.eq.s32.totalorder %s2639_s19, 0 }
  0xf2   : > { %1944 = dma.done.wait (%p2642_p6), [#allocation7], 1024   ;;  %p2643_p3 = pmov %p2642_p6 }
  0xf4   : > { %1946 = vsyncadd (%p2643_p3), [#allocation7], 4294966272  ;;  %p2644_p2 = pmov %p2643_p3 }
  0xf6   : > { %1948 = dma.done.wait (%p2644_p2), [#allocation10], 1040   ;;  %p2645_p13 = pmov %p2644_p2 }
  0xf7   : > { %p2646_p8 = pmov %p2644_p2 }
  0xf8   : > { %1950 = vsyncadd (%p2645_p13), [#allocation10], 4294966256 }
  0xf9   : > { %1952 = dma.done.wait (%p2646_p8), [#allocation13], 16   ;;  %p2647_p7 = pmov %p2644_p2 }
  0xfa   : > { %s2648_s7 = sld [smem:[#allocation22_spill]]  ;;  %s2649_s14 = sld [smem:[#allocation23_spill]] }
  0xfb   : > { %1954 = vsyncadd (%p2647_p7), [#allocation13], 4294967280 }
 0x100   : > { %s377_s21 = sand.u32 1, %s2648_s7   ;;  %p1265_p0 = scmp.ne.s32.totalorder %s2649_s14, 0 }
 0x101   : > { %s1264_s5 = sshll.u32 %s377_s21, 7  ;;  %v2024_v0 = vmov (!%p1265_p0), 0.0  }
 0x102   : > { %s2449_s3 = scalar_lea.vmem [#allocation14], %s1264_s5  ;;  %387 = sbr.rel (%p1265_p0) target bundleno = 266 (0x10a), region = 72  ;;  %388 = vst [vmem:[#allocation2] sm:$0xff] (!%p1265_p0), %v2024_v0  ;;  %389 = vst [vmem:[#allocation2 + $0x8] sm:$0xff] (!%p1265_p0), %v2024_v0 }
 0x103   : > { %390 = vst [vmem:[#allocation2 + $0x10] sm:$0xff] (!%p1265_p0), %v2024_v0  ;;  %391 = vst [vmem:[#allocation2 + $0x18] sm:$0xff] (!%p1265_p0), %v2024_v0 }
 0x104   : > { %392 = vst [vmem:[#allocation2 + $0x20] sm:$0xff] (!%p1265_p0), %v2024_v0  ;;  %393 = vst [vmem:[#allocation2 + $0x28] sm:$0xff] (!%p1265_p0), %v2024_v0 }
 0x105   : > { %394 = vst [vmem:[#allocation2 + $0x30] sm:$0xff] (!%p1265_p0), %v2024_v0  ;;  %395 = vst [vmem:[#allocation2 + $0x38] sm:$0xff] (!%p1265_p0), %v2024_v0 }
 0x106   : > { %396 = vst [vmem:[#allocation2 + $0x40] sm:$0xff] (!%p1265_p0), %v2024_v0  ;;  %397 = vst [vmem:[#allocation2 + $0x48] sm:$0xff] (!%p1265_p0), %v2024_v0 }
 0x107   : > { %398 = vst [vmem:[#allocation2 + $0x50] sm:$0xff] (!%p1265_p0), %v2024_v0  ;;  %399 = vst [vmem:[#allocation2 + $0x58] sm:$0xff] (!%p1265_p0), %v2024_v0 }
 0x108   : > { %400 = vst [vmem:[#allocation2 + $0x60] sm:$0xff] (!%p1265_p0), %v2024_v0  ;;  %401 = vst [vmem:[#allocation2 + $0x68] sm:$0xff] (!%p1265_p0), %v2024_v0 }
 0x109   : > { %402 = vst [vmem:[#allocation2 + $0x70] sm:$0xff] %v2024_v0  ;;  %403 = vst [vmem:[#allocation2 + $0x78] sm:$0xff] %v2024_v0 }
 0x10a PF: > { %v1647_v1 = vld [vmem:[%s2428_s17] sm:$0xff]   ;;  %v1648_v2 = vld [vmem:[%s2428_s17 + $0x8] sm:$0xff]   ;;  %v1649_v3 = vld [vmem:[%s2428_s17 + $0x10] sm:$0xff]   ;;  %s2650_s15 = sld [smem:[#allocation23_spill]] }
 0x10b   : > { %1356 = vmatprep.subr.bf16.mxu0 %v1647_v1  ;;  %1452 = vmatprep.subr.bf16.mxu1 %v1647_v1  ;;  %v1650_v4 = vld [vmem:[%s2428_s17 + $0x18] sm:$0xff]   ;;  %v1655_v5 = vld [vmem:[%s2420_s20] sm:$0xff]   ;;  %v1652_v8 = vld [vmem:[%s2428_s17 + $0x28] sm:$0xff]  }
 0x10c   : > { %1357 = vmatpush3.bf16.msra.mxu0 %v1647_v1  ;;  %1460 = vmatpush3.bf16.msra.mxu1 %v1647_v1  ;;  %v1656_v6 = vld [vmem:[%s2420_s20 + $0x20] sm:$0xff]   ;;  %v1653_v9 = vld [vmem:[%s2428_s17 + $0x30] sm:$0xff]   ;;  %v1654_v10 = vld [vmem:[%s2428_s17 + $0x38] sm:$0xff]  }
 0x10d   : > { %1358 = vmatprep.subr.bf16.mxu0 %v1648_v2  ;;  %1453 = vmatprep.subr.bf16.mxu1 %v1648_v2  ;;  %v1651_v7 = vld [vmem:[%s2428_s17 + $0x20] sm:$0xff]   ;;  %v1657_v11 = vld [vmem:[%s2420_s20 + $0x8] sm:$0xff]   ;;  %v1659_v13 = vld [vmem:[%s2420_s20 + $0x10] sm:$0xff]  }
 0x10e   : > { %1372 = vmatprep.mubr.bf16.mxu0 %v1655_v5  ;;  %1380 = vmatprep.mubr.bf16.mxu1 %v1656_v6  ;;  %v1658_v12 = vld [vmem:[%s2420_s20 + $0x28] sm:$0xff]   ;;  %v1660_v14 = vld [vmem:[%s2420_s20 + $0x30] sm:$0xff]   ;;  %v1661_v15 = vld [vmem:[%s2420_s20 + $0x18] sm:$0xff]  }
 0x10f   : > { %v1662_v16 = vld [vmem:[%s2420_s20 + $0x38] sm:$0xff]   ;;  %v406_v17 = vld [vmem:[#allocation2 + $0x10] sm:$0xff]  ;;  %v404_v19 = vld [vmem:[#allocation2] sm:$0xff] }
 0x110   : > { %1359 = vmatpush3.bf16.msra.mxu0 %v1648_v2  ;;  %1461 = vmatpush3.bf16.msra.mxu1 %v1648_v2  ;;  %v414_v18 = vld [vmem:[#allocation2 + $0x50] sm:$0xff]  ;;  %v412_v20 = vld [vmem:[#allocation2 + $0x40] sm:$0xff]  ;;  %v407_v23 = vld [vmem:[#allocation2 + $0x18] sm:$0xff]  ;;  %p1282_p5 = scmp.ne.s32.totalorder %s2650_s15, 4 }
 0x111   : > { %1360 = vmatprep.subr.bf16.mxu0 %v1649_v3  ;;  %1454 = vmatprep.subr.bf16.mxu1 %v1649_v3  ;;  %v415_v24 = vld [vmem:[#allocation2 + $0x58] sm:$0xff]  ;;  %v405_v29 = vld [vmem:[#allocation2 + $0x8] sm:$0xff]  ;;  %v410_v41 = vld [vmem:[#allocation2 + $0x30] sm:$0xff] }
 0x112   : > { %v413_v30 = vld [vmem:[#allocation2 + $0x48] sm:$0xff]  ;;  %v418_v42 = vld [vmem:[#allocation2 + $0x70] sm:$0xff]  ;;  %v408_v43 = vld [vmem:[#allocation2 + $0x20] sm:$0xff] }
 0x113   : > { %v416_v44 = vld [vmem:[#allocation2 + $0x60] sm:$0xff]  ;;  %v411_v47 = vld [vmem:[#allocation2 + $0x38] sm:$0xff]  ;;  %v409_v53 = vld [vmem:[#allocation2 + $0x28] sm:$0xff] }
 0x114   : > { %1361 = vmatpush3.bf16.msra.mxu0 %v1649_v3  ;;  %1462 = vmatpush3.bf16.msra.mxu1 %v1649_v3  ;;  %v419_v48 = vld [vmem:[#allocation2 + $0x78] sm:$0xff]  ;;  %v417_v54 = vld [vmem:[#allocation2 + $0x68] sm:$0xff]  ;;  %v1663_v1 = vld [vmem:[#allocation8] sm:$0xff] (!%p1282_p5)  }
 0x115   : > { %1362 = vmatprep.subr.bf16.mxu0 %v1650_v4  ;;  %1455 = vmatprep.subr.bf16.mxu1 %v1650_v4  ;;  %v1664_v2 = vld [vmem:[#allocation8 + $0x8] sm:$0xff] (!%p1282_p5)   ;;  %v1665_v3 = vld [vmem:[#allocation8 + $0x10] sm:$0xff] (!%p1282_p5)  }
 0x118   : > { %1363 = vmatpush3.bf16.msra.mxu0 %v1650_v4  ;;  %1463 = vmatpush3.bf16.msra.mxu1 %v1650_v4  ;;  %v1666_v4 = vld [vmem:[#allocation8 + $0x18] sm:$0xff] (!%p1282_p5)  }
 0x119   : > { %1364 = vmatprep.subr.bf16.mxu0 %v1651_v7  ;;  %1456 = vmatprep.subr.bf16.mxu1 %v1651_v7 }
 0x11c   : > { %1365 = vmatpush3.bf16.msra.mxu0 %v1651_v7  ;;  %1464 = vmatpush3.bf16.msra.mxu1 %v1651_v7 }
 0x11d   : > { %1366 = vmatprep.subr.bf16.mxu0 %v1652_v8  ;;  %1457 = vmatprep.subr.bf16.mxu1 %v1652_v8 }
 0x120   : > { %1367 = vmatpush3.bf16.msra.mxu0 %v1652_v8  ;;  %1465 = vmatpush3.bf16.msra.mxu1 %v1652_v8  ;;  %v1667_v8 = vld [vmem:[#allocation8 + $0x20] sm:$0xff] (!%p1282_p5)  }
 0x121   : > { %1368 = vmatprep.subr.bf16.mxu0 %v1653_v9  ;;  %1458 = vmatprep.subr.bf16.mxu1 %v1653_v9 }
 0x124   : > { %1369 = vmatpush3.bf16.msra.mxu0 %v1653_v9  ;;  %1466 = vmatpush3.bf16.msra.mxu1 %v1653_v9  ;;  %v1671_v9 = vld [vmem:[#allocation11] sm:$0xff] (!%p1282_p5)  }
 0x125   : > { %1370 = vmatprep.subr.bf16.mxu0 %v1654_v10  ;;  %1459 = vmatprep.subr.bf16.mxu1 %v1654_v10 }
 0x128   : > { %1371 = vmatpush3.bf16.msra.mxu0 %v1654_v10  ;;  %1467 = vmatpush3.bf16.msra.mxu1 %v1654_v10  ;;  %v1672_v10 = vld [vmem:[#allocation11 + $0x8] sm:$0xff] (!%p1282_p5)  }
 0x129   : > { %1388 = vmatprep.subr.bf16.mxu0 (!%p1282_p5), %v1663_v1  ;;  %1420 = vmatprep.subr.bf16.mxu1 (!%p1282_p5), %v1671_v9 }
 0x12b   : > { %1373 = vmatmul.mubr.bf16.vlgmr.msra.gmra.mrb[0].mxu0 %v1657_v11  ;;  %1381 = vmatmul.mubr.bf16.vlgmr.msra.gmra.mrb[0].mxu1 %v1658_v12  ;;  %v1668_v11 = vld [vmem:[#allocation8 + $0x28] sm:$0xff] (!%p1282_p5)   ;;  %v1673_v12 = vld [vmem:[#allocation11 + $0x10] sm:$0xff] (!%p1282_p5)  }
 0x12c   : > { %1376 = vmatprep.mubr.bf16.mxu0 %v1659_v13  ;;  %1384 = vmatprep.mubr.bf16.mxu1 %v1660_v14  ;;  %v1669_v13 = vld [vmem:[#allocation8 + $0x30] sm:$0xff] (!%p1282_p5)   ;;  %v1674_v14 = vld [vmem:[#allocation11 + $0x18] sm:$0xff] (!%p1282_p5)  }
 0x12d   : > { %1389 = vmatpush3.bf16.msra.mxu0 (!%p1282_p5), %v1663_v1  ;;  %1421 = vmatpush3.bf16.msra.mxu1 (!%p1282_p5), %v1671_v9 }
 0x12e   : > { %1390 = vmatprep.subr.bf16.mxu0 (!%p1282_p5), %v1664_v2  ;;  %1422 = vmatprep.subr.bf16.mxu1 (!%p1282_p5), %v1672_v10 }
 0x131   : > { %1391 = vmatpush3.bf16.msra.mxu0 (!%p1282_p5), %v1664_v2  ;;  %1423 = vmatpush3.bf16.msra.mxu1 (!%p1282_p5), %v1672_v10 }
 0x132   : > { %1392 = vmatprep.subr.bf16.mxu0 (!%p1282_p5), %v1665_v3  ;;  %1424 = vmatprep.subr.bf16.mxu1 (!%p1282_p5), %v1673_v12 }
 0x133   : > { %1377 = vmatmul.mubr.bf16.gmra.mrb[4].mxu0 %v1661_v15  ;;  %1385 = vmatmul.mubr.bf16.gmra.mrb[4].mxu1 %v1662_v16  ;;  %v1670_v15 = vld [vmem:[#allocation8 + $0x38] sm:$0xff] (!%p1282_p5)   ;;  %v1675_v16 = vld [vmem:[#allocation11 + $0x20] sm:$0xff] (!%p1282_p5)  }
 0x135   : > { %1393 = vmatpush3.bf16.msra.mxu0 (!%p1282_p5), %v1665_v3  ;;  %1425 = vmatpush3.bf16.msra.mxu1 (!%p1282_p5), %v1673_v12 }
 0x136   : > { %1394 = vmatprep.subr.bf16.mxu0 (!%p1282_p5), %v1666_v4  ;;  %1426 = vmatprep.subr.bf16.mxu1 (!%p1282_p5), %v1674_v14 }
 0x139   : > { %1395 = vmatpush3.bf16.msra.mxu0 (!%p1282_p5), %v1666_v4  ;;  %1427 = vmatpush3.bf16.msra.mxu1 (!%p1282_p5), %v1674_v14 }
 0x13a   : > { %1396 = vmatprep.subr.bf16.mxu0 (!%p1282_p5), %v1667_v8  ;;  %1428 = vmatprep.subr.bf16.mxu1 (!%p1282_p5), %v1675_v16 }
 0x13d   : > { %1397 = vmatpush3.bf16.msra.mxu0 (!%p1282_p5), %v1667_v8  ;;  %1429 = vmatpush3.bf16.msra.mxu1 (!%p1282_p5), %v1675_v16 }
 0x13e   : > { %1398 = vmatprep.subr.bf16.mxu0 (!%p1282_p5), %v1668_v11 }
 0x141   : > { %1399 = vmatpush3.bf16.msra.mxu0 (!%p1282_p5), %v1668_v11 }
 0x142   : > { %1400 = vmatprep.subr.bf16.mxu0 (!%p1282_p5), %v1669_v13 }
 0x145   : > { %1401 = vmatpush3.bf16.msra.mxu0 (!%p1282_p5), %v1669_v13 }
 0x146   : > { %1402 = vmatprep.subr.bf16.mxu0 (!%p1282_p5), %v1670_v15 }
 0x149   : > { %1403 = vmatpush3.bf16.msra.mxu0 (!%p1282_p5), %v1670_v15 }
 0x1fe   : > { %v1374_v21 = vpop.f32.mrb[0].mxu0  ;;  %v1382_v22 = vpop.f32.mrb[0].mxu1 }
 0x1ff   : > { %v647_v25 = vadd.f32 %v1374_v21, %v406_v17  ;;  %v655_v26 = vadd.f32 %v1382_v22, %v414_v18  ;;  %v582_v27 = vpop.f32.mrb[1].mxu0  ;;  %v614_v28 = vpop.f32.mrb[1].mxu1  ;;  %v1676_v22 = vld [vmem:[#allocation11 + $0x28] sm:$0xff] (!%p1282_p5)  }
 0x200   : > { %v645_v31 = vadd.f32 %v582_v27, %v404_v19  ;;  %v653_v32 = vadd.f32 %v614_v28, %v412_v20  ;;  %v1375_v33 = vpop.f32.mrb[2].mxu0  ;;  %v1383_v34 = vpop.f32.mrb[2].mxu1  ;;  %1430 = vmatprep.subr.bf16.mxu1 (!%p1282_p5), %v1676_v22 }
 0x201   : > { %663 = vst [vmem:[#allocation2 + $0x10] sm:$0xff] %v647_v25  ;;  %671 = vst [vmem:[#allocation2 + $0x50] sm:$0xff] %v655_v26  ;;  %v648_v35 = vadd.f32 %v1375_v33, %v407_v23  ;;  %v656_v36 = vadd.f32 %v1383_v34, %v415_v24  ;;  %v585_v37 = vpop.f32.mrb[3].mxu0  ;;  %v617_v38 = vpop.f32.mrb[3].mxu1  ;;  %1431 = vmatpush3.bf16.msra.mxu1 (!%p1282_p5), %v1676_v22 }
 0x202   : > { %661 = vst [vmem:[#allocation2] sm:$0xff] %v645_v31  ;;  %669 = vst [vmem:[#allocation2 + $0x40] sm:$0xff] %v653_v32  ;;  %v646_v39 = vadd.f32 %v585_v37, %v405_v29  ;;  %v654_v40 = vadd.f32 %v617_v38, %v413_v30 }
 0x203   : > { %664 = vst [vmem:[#allocation2 + $0x18] sm:$0xff] %v648_v35  ;;  %672 = vst [vmem:[#allocation2 + $0x58] sm:$0xff] %v656_v36 }
 0x204   : > { %662 = vst [vmem:[#allocation2 + $0x8] sm:$0xff] %v646_v39  ;;  %670 = vst [vmem:[#allocation2 + $0x48] sm:$0xff] %v654_v40  ;;  %v1677_v39 = vld [vmem:[#allocation11 + $0x30] sm:$0xff] (!%p1282_p5)   ;;  %v1678_v40 = vld [vmem:[#allocation11 + $0x38] sm:$0xff] (!%p1282_p5)  }
 0x205   : > { %1432 = vmatprep.subr.bf16.mxu1 (!%p1282_p5), %v1677_v39 }
 0x206   : > { %v1378_v45 = vpop.f32.mrb[4].mxu0  ;;  %v1386_v46 = vpop.f32.mrb[4].mxu1  ;;  %680 = sbr.rel (%p1282_p5) target bundleno = 991 (0x3df), region = 76  ;;  %1433 = vmatpush3.bf16.msra.mxu1 (!%p1282_p5), %v1677_v39 }
 0x207   : > { %v651_v49 = vadd.f32 %v1378_v45, %v410_v41  ;;  %v659_v50 = vadd.f32 %v1386_v46, %v418_v42  ;;  %v598_v51 = vpop.f32.mrb[5].mxu0  ;;  %v630_v52 = vpop.f32.mrb[5].mxu1  ;;  %1434 = vmatprep.subr.bf16.mxu1 (!%p1282_p5), %v1678_v40  ;;  %v1283_v41 = vld [vmem:[#allocation9] ss:$0 sm:$0xff] (!%p1282_p5) }
 0x208   : > { %v649_v55 = vadd.f32 %v598_v51, %v408_v43  ;;  %v657_v56 = vadd.f32 %v630_v52, %v416_v44  ;;  %v1379_v57 = vpop.f32.mrb[6].mxu0  ;;  %v1387_v58 = vpop.f32.mrb[6].mxu1  ;;  %v683_v17 = vld [vmem:[#allocation2 + $0x10] sm:$0xff] (!%p1282_p5) }
 0x209   : > { %667 = vst [vmem:[#allocation2 + $0x30] sm:$0xff] %v651_v49  ;;  %675 = vst [vmem:[#allocation2 + $0x70] sm:$0xff] %v659_v50  ;;  %v652_v59 = vadd.f32 %v1379_v57, %v411_v47  ;;  %v660_v60 = vadd.f32 %v1387_v58, %v419_v48  ;;  %v601_v61 = vpop.f32.mrb[7].mxu0  ;;  %v633_v62 = vpop.f32.mrb[7].mxu1  ;;  %v681_v5 = vld [vmem:[#allocation2] sm:$0xff] (!%p1282_p5)  ;;  %v691_v30 = vld [vmem:[#allocation2 + $0x50] sm:$0xff] (!%p1282_p5) }
 0x20a   : > { %665 = vst [vmem:[#allocation2 + $0x20] sm:$0xff] %v649_v55  ;;  %673 = vst [vmem:[#allocation2 + $0x60] sm:$0xff] %v657_v56  ;;  %v650_v63 = vadd.f32 %v601_v61, %v409_v53  ;;  %v658_v0 = vadd.f32 %v633_v62, %v417_v54  ;;  %v684_v18 = vld [vmem:[#allocation2 + $0x18] sm:$0xff] (!%p1282_p5)  ;;  %v689_v26 = vld [vmem:[#allocation2 + $0x40] sm:$0xff] (!%p1282_p5)  ;;  %1435 = vmatpush3.bf16.msra.mxu1 (!%p1282_p5), %v1678_v40 }
 0x20b   : > { %668 = vst [vmem:[#allocation2 + $0x38] sm:$0xff] %v652_v59  ;;  %676 = vst [vmem:[#allocation2 + $0x78] sm:$0xff] %v660_v60  ;;  %v682_v6 = vld [vmem:[#allocation2 + $0x8] sm:$0xff] (!%p1282_p5)  ;;  %v698_v21 = vpack.c.bf16 (!%p1282_p5), %v684_v18, %v683_v17  ;;  %v692_v31 = vld [vmem:[#allocation2 + $0x58] sm:$0xff] (!%p1282_p5) }
 0x20c   : > { %666 = vst [vmem:[#allocation2 + $0x28] sm:$0xff] %v650_v63  ;;  %674 = vst [vmem:[#allocation2 + $0x68] sm:$0xff] %v658_v0  ;;  %v697_v7 = vpack.c.bf16 (!%p1282_p5), %v682_v6, %v681_v5  ;;  %v690_v27 = vld [vmem:[#allocation2 + $0x48] sm:$0xff] (!%p1282_p5)  ;;  %v702_v34 = vpack.c.bf16 (!%p1282_p5), %v692_v31, %v691_v30 }
 0x20d   : > { %v701_v29 = vpack.c.bf16 %v690_v27, %v689_v26 }
 0x20e   : > { %1404 = vmatprep.mubr.bf16.mxu0 %v697_v7 }
 0x20f   : > { %1405 = vmatmul.mubr.bf16.vlgmr.msra.gmra.mrb[0].mxu0 %v698_v21 }
 0x210   : > { %v687_v24 = vld [vmem:[#allocation2 + $0x30] sm:$0xff] }
 0x211   : > { %v685_v19 = vld [vmem:[#allocation2 + $0x20] sm:$0xff]  ;;  %v695_v36 = vld [vmem:[#allocation2 + $0x70] sm:$0xff] }
 0x212   : > { %v688_v25 = vld [vmem:[#allocation2 + $0x38] sm:$0xff]  ;;  %v693_v32 = vld [vmem:[#allocation2 + $0x60] sm:$0xff] }
 0x213   : > { %v686_v20 = vld [vmem:[#allocation2 + $0x28] sm:$0xff]  ;;  %v700_v28 = vpack.c.bf16 %v688_v25, %v687_v24  ;;  %v696_v37 = vld [vmem:[#allocation2 + $0x78] sm:$0xff] }
 0x214   : > { %v699_v23 = vpack.c.bf16 %v686_v20, %v685_v19  ;;  %v694_v33 = vld [vmem:[#allocation2 + $0x68] sm:$0xff]  ;;  %v704_v38 = vpack.c.bf16 %v696_v37, %v695_v36 }
 0x215   : > { %v703_v35 = vpack.c.bf16 %v694_v33, %v693_v32 }
 0x216   : > { %1408 = vmatprep.mubr.bf16.mxu0 %v699_v23 }
 0x217   : > { %1409 = vmatmul.mubr.bf16.gmra.mrb[4].mxu0 %v700_v28 }
 0x218   : > { %1412 = vmatprep.mubr.bf16.mxu0 %v701_v29 }
 0x21f   : > { %1413 = vmatmul.mubr.bf16.gmra.mrb[8].mxu0 %v702_v34  ;;  %v1292_v34 = vld [vmem:[#allocation12] ss:$0 sm:$0xff] }
 0x220   : > { %1416 = vmatprep.mubr.bf16.mxu0 %v703_v35 }
 0x227   : > { %1417 = vmatmul.mubr.bf16.gmra.mrb[12].mxu0 %v704_v38 }
 0x2e2   : > { %v1406_v42 = vpop.f32.mrb[0].mxu0 }
 0x2e3   : > { %v819_v43 = vadd.f32 %v1406_v42, %v1283_v41  ;;  %v810_v44 = vpop.f32.mrb[1].mxu0 }
 0x2e4   : > { %v811_v45 = vadd.f32 %v1283_v41, %v810_v44  ;;  %v1407_v46 = vpop.f32.mrb[2].mxu0 }
 0x2e5   : > { %v822_v47 = vadd.f32 %v1407_v46, %v1283_v41  ;;  %v813_v48 = vpop.f32.mrb[3].mxu0  ;;  %v875_v50 = vmax.f32 %v819_v43, 0.0 }
 0x2e6   : > { %v814_v49 = vadd.f32 %v1283_v41, %v813_v48  ;;  %v873_v52 = vmax.f32 %v811_v45, 0.0 }
 0x2e7   : > { %v876_v51 = vmax.f32 %v822_v47, 0.0 }
 0x2e8   : > { %v874_v53 = vmax.f32 %v814_v49, 0.0 }
 0x2e9   : > { %v890_v54 = vpack.c.bf16 %v876_v51, %v875_v50 }
 0x2ea   : > { %v1410_v55 = vpop.f32.mrb[4].mxu0  ;;  %v889_v56 = vpack.c.bf16 %v874_v53, %v873_v52 }
 0x2eb   : > { %v835_v57 = vadd.f32 %v1410_v55, %v1283_v41  ;;  %v826_v58 = vpop.f32.mrb[5].mxu0 }
 0x2ec   : > { %v827_v59 = vadd.f32 %v1283_v41, %v826_v58  ;;  %v1411_v60 = vpop.f32.mrb[6].mxu0  ;;  %1436 = vmatprep.mubr.bf16.mxu1 %v889_v56 }
 0x2ed   : > { %v838_v61 = vadd.f32 %v1411_v60, %v1283_v41  ;;  %v829_v62 = vpop.f32.mrb[7].mxu0  ;;  %1437 = vmatmul.mubr.bf16.vlgmr.msra.gmra.mrb[0].mxu1 %v890_v54  ;;  %v879_v0 = vmax.f32 %v835_v57, 0.0 }
 0x2ee   : > { %v830_v63 = vadd.f32 %v1283_v41, %v829_v62  ;;  %v877_v2 = vmax.f32 %v827_v59, 0.0 }
 0x2ef   : > { %v880_v1 = vmax.f32 %v838_v61, 0.0 }
 0x2f0   : > { %v878_v3 = vmax.f32 %v830_v63, 0.0 }
 0x2f1   : > { %v892_v4 = vpack.c.bf16 %v880_v1, %v879_v0 }
 0x2f2   : > { %v891_v5 = vpack.c.bf16 %v878_v3, %v877_v2  ;;  %v1414_v6 = vpop.f32.mrb[8].mxu0 }
 0x2f3   : > { %v851_v7 = vadd.f32 %v1414_v6, %v1283_v41  ;;  %v842_v8 = vpop.f32.mrb[9].mxu0 }
 0x2f4   : > { %v843_v9 = vadd.f32 %v1283_v41, %v842_v8  ;;  %v1415_v10 = vpop.f32.mrb[10].mxu0  ;;  %1440 = vmatprep.mubr.bf16.mxu1 %v891_v5 }
 0x2f5   : > { %v854_v11 = vadd.f32 %v1415_v10, %v1283_v41  ;;  %v845_v12 = vpop.f32.mrb[11].mxu0  ;;  %1441 = vmatmul.mubr.bf16.gmra.mrb[4].mxu1 %v892_v4  ;;  %v883_v14 = vmax.f32 %v851_v7, 0.0 }
 0x2f6   : > { %v846_v13 = vadd.f32 %v1283_v41, %v845_v12  ;;  %v881_v16 = vmax.f32 %v843_v9, 0.0 }
 0x2f7   : > { %v884_v15 = vmax.f32 %v854_v11, 0.0 }
 0x2f8   : > { %v882_v17 = vmax.f32 %v846_v13, 0.0 }
 0x2f9   : > { %v894_v18 = vpack.c.bf16 %v884_v15, %v883_v14 }
 0x2fa   : > { %v893_v19 = vpack.c.bf16 %v882_v17, %v881_v16  ;;  %v1418_v20 = vpop.f32.mrb[12].mxu0 }
 0x2fb   : > { %v867_v21 = vadd.f32 %v1418_v20, %v1283_v41  ;;  %v858_v22 = vpop.f32.mrb[13].mxu0 }
 0x2fc   : > { %v859_v23 = vadd.f32 %v1283_v41, %v858_v22  ;;  %v1419_v24 = vpop.f32.mrb[14].mxu0  ;;  %1444 = vmatprep.mubr.bf16.mxu1 %v893_v19 }
 0x2fd   : > { %v870_v25 = vadd.f32 %v1419_v24, %v1283_v41  ;;  %v861_v26 = vpop.f32.mrb[15].mxu0  ;;  %1445 = vmatmul.mubr.bf16.gmra.mrb[8].mxu1 %v894_v18  ;;  %v887_v28 = vmax.f32 %v867_v21, 0.0 }
 0x2fe   : > { %v862_v27 = vadd.f32 %v1283_v41, %v861_v26  ;;  %v885_v30 = vmax.f32 %v859_v23, 0.0 }
 0x2ff   : > { %v888_v29 = vmax.f32 %v870_v25, 0.0 }
 0x300   : > { %v886_v31 = vmax.f32 %v862_v27, 0.0 }
 0x301   : > { %v896_v32 = vpack.c.bf16 %v888_v29, %v887_v28 }
 0x302   : > { %v895_v33 = vpack.c.bf16 %v886_v31, %v885_v30 }
 0x304   : > { %1448 = vmatprep.mubr.bf16.mxu1 %v895_v33 }
 0x305   : > { %1449 = vmatmul.mubr.bf16.gmra.mrb[12].mxu1 %v896_v32 }
 0x3c0   : > { %v1438_v35 = vpop.f32.mrb[0].mxu1 }
 0x3c1   : > { %v1011_v36 = vadd.f32 %v1438_v35, %v1292_v34  ;;  %v1002_v37 = vpop.f32.mrb[1].mxu1 }
 0x3c2   : > { %v1003_v38 = vadd.f32 %v1292_v34, %v1002_v37  ;;  %v1439_v39 = vpop.f32.mrb[2].mxu1 }
 0x3c3   : > { %1067 = vst [vmem:[%s2449_s3 + $0x10] sm:$0xff] %v1011_v36  ;;  %v1014_v40 = vadd.f32 %v1439_v39, %v1292_v34  ;;  %v1005_v41 = vpop.f32.mrb[3].mxu1 }
 0x3c4   : > { %1065 = vst [vmem:[%s2449_s3] sm:$0xff] %v1003_v38  ;;  %v1006_v42 = vadd.f32 %v1292_v34, %v1005_v41 }
 0x3c5   : > { %1068 = vst [vmem:[%s2449_s3 + $0x18] sm:$0xff] %v1014_v40 }
 0x3c6   : > { %1066 = vst [vmem:[%s2449_s3 + $0x8] sm:$0xff] %v1006_v42 }
 0x3c8   : > { %v1442_v43 = vpop.f32.mrb[4].mxu1 }
 0x3c9   : > { %v1027_v44 = vadd.f32 %v1442_v43, %v1292_v34  ;;  %v1018_v45 = vpop.f32.mrb[5].mxu1 }
 0x3ca   : > { %v1019_v46 = vadd.f32 %v1292_v34, %v1018_v45  ;;  %v1443_v47 = vpop.f32.mrb[6].mxu1 }
 0x3cb   : > { %1071 = vst [vmem:[%s2449_s3 + $0x30] sm:$0xff] %v1027_v44  ;;  %v1030_v48 = vadd.f32 %v1443_v47, %v1292_v34  ;;  %v1021_v49 = vpop.f32.mrb[7].mxu1 }
 0x3cc   : > { %1069 = vst [vmem:[%s2449_s3 + $0x20] sm:$0xff] %v1019_v46  ;;  %v1022_v50 = vadd.f32 %v1292_v34, %v1021_v49 }
 0x3cd   : > { %1072 = vst [vmem:[%s2449_s3 + $0x38] sm:$0xff] %v1030_v48 }
 0x3ce   : > { %1070 = vst [vmem:[%s2449_s3 + $0x28] sm:$0xff] %v1022_v50 }
 0x3d0   : > { %v1446_v51 = vpop.f32.mrb[8].mxu1 }
 0x3d1   : > { %v1043_v52 = vadd.f32 %v1446_v51, %v1292_v34  ;;  %v1034_v53 = vpop.f32.mrb[9].mxu1 }
 0x3d2   : > { %v1035_v54 = vadd.f32 %v1292_v34, %v1034_v53  ;;  %v1447_v55 = vpop.f32.mrb[10].mxu1 }
 0x3d3   : > { %1075 = vst [vmem:[%s2449_s3 + $0x50] sm:$0xff] %v1043_v52  ;;  %v1046_v56 = vadd.f32 %v1447_v55, %v1292_v34  ;;  %v1037_v57 = vpop.f32.mrb[11].mxu1 }
 0x3d4   : > { %1073 = vst [vmem:[%s2449_s3 + $0x40] sm:$0xff] %v1035_v54  ;;  %v1038_v58 = vadd.f32 %v1292_v34, %v1037_v57 }
 0x3d5   : > { %1076 = vst [vmem:[%s2449_s3 + $0x58] sm:$0xff] %v1046_v56 }
 0x3d6   : > { %1074 = vst [vmem:[%s2449_s3 + $0x48] sm:$0xff] %v1038_v58 }
 0x3d8   : > { %v1450_v59 = vpop.f32.mrb[12].mxu1 }
 0x3d9   : > { %v1059_v60 = vadd.f32 %v1450_v59, %v1292_v34  ;;  %v1050_v61 = vpop.f32.mrb[13].mxu1 }
 0x3da   : > { %v1051_v62 = vadd.f32 %v1292_v34, %v1050_v61  ;;  %v1451_v63 = vpop.f32.mrb[14].mxu1 }
 0x3db   : > { %1079 = vst [vmem:[%s2449_s3 + $0x70] sm:$0xff] %v1059_v60  ;;  %v1062_v0 = vadd.f32 %v1451_v63, %v1292_v34  ;;  %v1053_v1 = vpop.f32.mrb[15].mxu1 }
 0x3dc   : > { %1077 = vst [vmem:[%s2449_s3 + $0x60] sm:$0xff] %v1051_v62  ;;  %v1054_v2 = vadd.f32 %v1292_v34, %v1053_v1 }
 0x3dd   : > { %1080 = vst [vmem:[%s2449_s3 + $0x78] sm:$0xff] %v1062_v0 }
 0x3de   : > { %1078 = vst [vmem:[%s2449_s3 + $0x68] sm:$0xff] %v1054_v2 }
 0x3df PF: > { %s2651_s6 = sld [smem:[#allocation24_spill]]  ;;  %s2653_s20 = sld [smem:[#allocation28_spill]] }
 0x3e0   : > { %s2654_s13 = sld [smem:[#allocation34_spill]]  ;;  %s1095_s18 = sshll.u32 %s2449_s3, 4  ;;  %s2492_s18 = int_to_ptr.vmem [resolvable:$true] %s1095_s18 }
 0x3e1   : > { %s2496_s17 = scalar_lea.sflag [#allocation5], %s377_s21  ;;  %s1851_s7 = scalar_lea.vmem %s2492_s18, 2048 }
 0x3e2   : > { %p1852_p10 = scmp.ne.s32.totalorder %s2492_s18, %s1851_s7  ;;  %s2025_s5 = smov [#allocation14]  }
 0x3e3   : > { %s1855_s14 = sshll.u32 %s2025_s5, 4  ;;  %s1856_s14 = int_to_ptr.vmem [resolvable:$false] %s1855_s14 }
 0x3e4   : > { %s1857_s15 = scalar_lea.vmem %s1856_s14, 4096  ;;  %p1858_p12 = scmp.lt.s32.totalorder %s2492_s18, %s1856_s14 }
 0x3e5   : > { %s1307_s19 = sshll.u32 %s2651_s6, 11  ;;  %p2655_p4 = scmp.ne.s32.totalorder %s2653_s20, 0 }
 0x3e6   : > { %s2489_s2 = scalar_lea.hbm %s2654_s13, %s1307_s19  ;;  %p1859_p11 = scmp.lt.s32.totalorder %s1857_s15, %s1851_s7 }
 0x3e7   : > { %p1853_p1 = pnand %p1852_p10, %p2655_p4 }
 0x3e8   : > { %p1860_p6 = por %p1859_p11, %p1858_p12 }
 0x3e9   : > { %p1854_p9 = pneg %p1853_p1 }
 0x3eb   : > { %p1861_p3 = pnand %p1860_p6, %p1854_p9 }
 0x3ed   : > { %1864 = shalt.err (!%p1861_p3)
}
 0x3ee   : > { %s1865_s21 = scalar_lea.hbm %s2489_s2, 2048  ;;  %s1869_s27 = scalar_lea.hbm %s2654_s13, 10240 }
 0x3ef   : > { %p1866_p2 = scmp.ne.s32.totalorder %s2489_s2, %s1865_s21  ;;  %p1870_p7 = scmp.lt.u32.totalorder %s2489_s2, %s2654_s13 }
 0x3f0   : > { %p1871_p0 = scmp.lt.u32.totalorder %s1869_s27, %s1865_s21  ;;  %p1873_p10 = scmp.lt.u32.totalorder %s1865_s21, %s2489_s2 }
 0x3f1   : > { %p1867_p13 = pnand %p1866_p2, %p2655_p4 }
 0x3f2   : > { %p1872_p5 = por %p1871_p0, %p1870_p7 }
 0x3f3   : > { %p1868_p8 = pneg %p1867_p13 }
 0x3f4   : > { %p1874_p1 = por %p1873_p10, %p1872_p5 }
 0x3f6   : > { %p1875_p9 = pnand %p1874_p1, %p1868_p8 }
 0x3f8   : > { %1878 = shalt.err (!%p1875_p9)
}
 0x3f9   : > { %s2026_s22 = smov 128   ;;  %s2027_s7 = smov 8  }
 0x3fa   : > { %1489 = dma.vmem_to_hbm [thread:$0]  (%p2655_p4), %s2492_s18, 2048, %s2489_s2, %s2496_s17, %s2026_s22, %s2026_s22, %s2027_s7  }
 0x3fb PF: > { %s2656_s5 = sld [smem:[#allocation21_spill]]  ;;  %s2657_s14 = sld [smem:[#allocation29_spill]] }
 0x3fc   : > { %p1524_p12 = scmp.ge.s32.totalorder %s2013_s10, 2 }
 0x401   : > { %s1110_s15 = sand.u32 1, %s2656_s5   ;;  %p2658_p11 = scmp.ne.s32.totalorder %s2657_s14, 0 }
 0x402   : > { %s1111_s21 = scalar_lea.sflag [#allocation5], %s1110_s15 }
 0x403   : > { %p1512_p6 = pnand %p1524_p12, %p2658_p11 }
 0x405   : > { %1956 = dma.done.wait (!%p1512_p6), %s1111_s21, 2048  }
 0x406   : > { %1958 = vsyncadd (!%p1512_p6), %s1111_s21, 4294965248  ;;  %s27_s10 = sadd.s32 1, %s2013_s10   ;;  %s2660_s21 = sld [smem:[#allocation22_spill]] }
 0x407   : > { %p2525_p3 = scmp.ge.s32.totalorder %s27_s10, 27   ;;  %s2661_s20 = smov %s2366_s24 }
 0x408   : > { %s2662_s2 = smov %s2676_s30  ;;  %s2663_s22 = smov %s1969_s23 }
 0x409   : > { %s2664_s23 = smov %s2309_s12  ;;  %s2665_s24 = smov %s1977_s25 }
 0x40a   : > { %s2666_s25 = smov %s1981_s26  ;;  %s2667_s26 = smov %s2661_s20 }
 0x40b   : > { %s2668_s27 = smov %s1989_s28  ;;  %s2669_s28 = smov %s1993_s29 }
 0x40c   : > { %s2670_s29 = smov %s2312_s11  ;;  %s2671_s30 = smov %s2005_s8 }
 0x40d   : > { %s2672_s7 = smov %s2009_s9  ;;  %s2673_s8 = smov %s2662_s2 }
 0x40e   : > { %s2674_s9 = smov %s2680_s16  ;;  %26 = sbr.rel (!%p2525_p3) target bundleno = 20 (0x14), region = 126 }
 0x415   :  { %1116 = vsyncpa [#allocation4], 1 }
 0x416   :  { %1118 = vsyncpa [#allocation4 + $0x1], 1 }
 0x417   :  { %1119 = vsyncpa [#allocation7], 1 }
 0x418   :  { %1121 = vsyncpa [#allocation7 + $0x1], 1 }
 0x419   :  { %1122 = vsyncpa [#allocation10], 1 }
 0x41a   :  { %1123 = vsyncpa [#allocation13], 1 }
 0x41b   :  { %1124 = vsyncpa [#allocation5], 1 }
 0x41c   :  { %1126 = vsyncpa [#allocation5 + $0x1], 1 }

</bundles_post_ra>
